<compile_context>
chip_gen: v7x
topology: tpu7x:2x2x1
jax: 0.10.0
libtpu: 0.0.40
codegen_flags: <defaults>
</compile_context>

<pallas_src>
import functools

import jax
import jax.numpy as jnp
import numpy as np
from jax.experimental import pallas as pl
from jax.experimental.pallas import tpu as pltpu

_SENT = -1.0e30  # finite "minus infinity" for masked logits (keeps f32 math NaN-free)


def _hier_loss_kernel(img_ref, txt_ref, code_ref, out_i2t_ref, out_t2i_ref, *,
                      tm, use_bf16_eup):
    """One row-block (TM rows) of the hierarchical contrastive loss.

    img_ref  : (N_pad, D_pad) f32, L2-normalised image features, pre-scaled by 1/T (resident)
    txt_ref  : (N_pad, D_pad) f32, L2-normalised text features (resident)
    code_ref : (TM, N_pad) int8 packed score codes for this row block
               (bit0 = pos: score > t1, bit1 = neg: score <= t2; padding = 0 -> self-masks)
    out_*    : (1, 8, 128) per-block partial sums, broadcast over the tile so the store is a
               full unmasked (8, 128) write (lane-dense output).
    """
    b = pl.program_id(0)
    row0 = pl.multiple_of(b * tm, tm)

    # --- masks / per-row counts: identical for both directions -> computed once ----------
    c = code_ref[...].astype(jnp.int32)
    pos_m = (c & 1) > 0
    neg_m = (c & 2) > 0
    n_pos = jnp.sum(pos_m.astype(jnp.float32), axis=1, keepdims=True)
    n_neg = jnp.sum(neg_m.astype(jnp.float32), axis=1, keepdims=True)
    # 1 / ((1 + n_neg) * n_pos); rows with zero positives (padding rows) contribute 0.
    inv = pl.reciprocal((1.0 + n_neg) * jnp.maximum(n_pos, 1.0))          # (TM, 1)

    def row_loss(logits):
        # Masked negatives materialized ONCE; reused by both the max and the exp-sum.
        neg_logits = jnp.where(neg_m, logits, _SENT)
        m_neg = jnp.max(neg_logits, axis=1, keepdims=True)
        s_neg = jnp.sum(jnp.exp(neg_logits - m_neg), axis=1, keepdims=True)
        lse_neg = jnp.where(n_neg > 0.0, m_neg + jnp.log(s_neg), _SENT)
        # softXEnt over {pos} U {neg}:  logaddexp(pos, lse_neg) - pos
        #   = relu(lse_neg - pos) + log(1 + exp(-|pos - lse_neg|))
        # -> only 1 exp + 1 log per (TM, N) element; the exp argument is always <= 0.
        diff = logits - lse_neg
        z = -jnp.abs(diff)
        if use_bf16_eup:
            # v6e / v7x: bf16 EUP transcendentals ~2x f32 throughput; accumulate in f32.
            sp = jnp.log(1.0 + jnp.exp(z.astype(jnp.bfloat16))).astype(jnp.float32)
        else:
            sp = jnp.log(1.0 + jnp.exp(z))
        dml = jnp.maximum(-diff, 0.0) + sp
        return jnp.sum(jnp.where(pos_m, dml, 0.0), axis=1, keepdims=True)  # (TM, 1)

    dn = (((1,), (1,)), ((), ()))   # contract the feature dim of both operands (A @ B.T)

    # i2t: logits[r, c] = <img_r, txt_c> / T   (1/T already folded into img, in f32)
    logits_i2t = jax.lax.dot_general(img_ref[pl.ds(row0, tm), :], txt_ref[...], dn,
                                     preferred_element_type=jnp.float32)
    rs_i2t = row_loss(logits_i2t)

    # t2i: logits[r, c] = <txt_r, img_c> / T.  A second small matmul keeps this direction
    # row-local too (no scores.T, no axis-0 online LSE, blocks stay independent/parallel).
    logits_t2i = jax.lax.dot_general(txt_ref[pl.ds(row0, tm), :], img_ref[...], dn,
                                     preferred_element_type=jnp.float32)
    rs_t2i = row_loss(logits_t2i)

    out_i2t_ref[...] = jnp.full((1, 8, 128), jnp.sum(rs_i2t * inv), jnp.float32)
    out_t2i_ref[...] = jnp.full((1, 8, 128), jnp.sum(rs_t2i * inv), jnp.float32)


def _round_up(x, m):
    return ((x + m - 1) // m) * m


def _bf16_eup_available():
    # v5e and older have no bf16 EUP/VPU -> keep the softplus path in f32 there.
    try:
        kind = jax.devices()[0].device_kind.lower()
    except Exception:
        return False
    return not any(v in kind for v in ("v2", "v3", "v4", "v5"))


def _pick_tile_and_vmem(n_pad, d_pad):
    """Choose the row-block size and a vmem_limit_bytes sized to the real footprint."""
    try:
        cap = int(pltpu.get_tpu_info().vmem_capacity_bytes) * 85 // 100
    except Exception:
        cap = 96 * 1024 * 1024          # conservative fallback
    cap = min(cap, 100 * 1024 * 1024)   # keep headroom even on 128 MiB parts

    def need(tm):
        feat = 2 * 2 * n_pad * d_pad * 4                      # resident img + txt (+ buffering)
        codes = 2 * tm * n_pad                                # double-buffered int8 code block
        temps = 8 * tm * n_pad * 4 + 2 * tm * d_pad * 4       # logits blocks + elementwise temps
        return feat + codes + temps + (4 << 20)

    tm = 128
    for cand in (512, 256, 128):
        if n_pad % cand == 0 and need(cand) <= cap:
            tm = cand
            break
    # TODO(synk): if even TM=128 exceeds the cap (N in the tens of thousands), add a second
    # (column) grid axis with an online LSE instead of keeping full-width rows resident.
    return tm, int(min(max(need(tm), 32 * 1024 * 1024), cap))


def hierarchical_loss(f_img, f_txt, scores, temperature, alpha_weight,
                      threshold1, threshold2):
    """Scalar hierarchical contrastive loss (forward of the PyTorch HierarchicalLoss)."""
    n, d = f_img.shape
    assert f_txt.shape == (n, d) and scores.shape == (n, n)

    n_pad = _round_up(max(n, 1), 128)
    d_pad = _round_up(max(d, 1), 128)

    # F.normalize(p=2, dim=1, eps=1e-12) == x * rsqrt(max(sum(x^2), eps^2)); 1/T is folded
    # into the image features once, in f32 (exact), so both directions carry exactly one 1/T.
    img = f_img.astype(jnp.float32)
    txt = f_txt.astype(jnp.float32)
    img_n = img * jax.lax.rsqrt(jnp.maximum(jnp.sum(img * img, axis=1, keepdims=True), 1e-24))
    txt_n = txt * jax.lax.rsqrt(jnp.maximum(jnp.sum(txt * txt, axis=1, keepdims=True), 1e-24))
    img_s = img_n * (1.0 / jnp.asarray(temperature, jnp.float32))

    img_p = jnp.zeros((n_pad, d_pad), jnp.float32).at[:n, :d].set(img_s)
    txt_p = jnp.zeros((n_pad, d_pad), jnp.float32).at[:n, :d].set(txt_n)

    # Scores are only ever compared against the thresholds: pre-threshold here and ship a
    # single packed int8 code (bit0 = pos, bit1 = neg).  Padding entries equal 0 and are
    # therefore neither positive nor negative (no in-kernel valid mask needed).
    s = scores.astype(jnp.float32)
    code = ((s > jnp.asarray(threshold1, jnp.float32)).astype(jnp.int8)
            + 2 * (s <= jnp.asarray(threshold2, jnp.float32)).astype(jnp.int8))
    code_p = jnp.zeros((n_pad, n_pad), jnp.int8).at[:n, :n].set(code)

    tm, vmem_limit = _pick_tile_and_vmem(n_pad, d_pad)
    num_blocks = n_pad // tm

    grid_spec = pltpu.PrefetchScalarGridSpec(
        num_scalar_prefetch=0,
        grid=(num_blocks,),
        in_specs=[
            pl.BlockSpec((n_pad, d_pad), lambda b: (0, 0)),   # img (resident full array)
            pl.BlockSpec((n_pad, d_pad), lambda b: (0, 0)),   # txt (resident full array)
            pl.BlockSpec((tm, n_pad), lambda b: (b, 0)),      # packed score codes (streamed)
        ],
        out_specs=[
            pl.BlockSpec((1, 8, 128), lambda b: (b, 0, 0)),   # per-block i2t partial
            pl.BlockSpec((1, 8, 128), lambda b: (b, 0, 0)),   # per-block t2i partial
        ],
    )

    part_i2t, part_t2i = pl.pallas_call(
        functools.partial(_hier_loss_kernel, tm=tm, use_bf16_eup=_bf16_eup_available()),
        out_shape=(jax.ShapeDtypeStruct((num_blocks, 8, 128), jnp.float32),
                   jax.ShapeDtypeStruct((num_blocks, 8, 128), jnp.float32)),
        grid_spec=grid_spec,
        compiler_params=pltpu.CompilerParams(
            dimension_semantics=("parallel",),
            vmem_limit_bytes=vmem_limit),
    )(img_p, txt_p, code_p)

    alpha = jnp.asarray(alpha_weight, jnp.float32)
    # Tiny scalar combine (alpha weighting + 1/N) done in the wrapper.
    return (alpha * jnp.sum(part_i2t[:, 0, 0])
            + (1.0 - alpha) * jnp.sum(part_t2i[:, 0, 0])) / n


def _reference_loss(f_img, f_txt, scores, temperature, alpha, t1, t2):
    """NumPy port of the PyTorch forward (loop form, data-dependent indexing)."""
    f_img = np.asarray(f_img, dtype=np.float64)
    f_txt = np.asarray(f_txt, dtype=np.float64)
    scores = np.asarray(scores, dtype=np.float64)

    def normalize(x):
        nrm = np.sqrt((x * x).sum(axis=1, keepdims=True))
        return x / np.maximum(nrm, 1e-12)

    img = normalize(f_img)
    txt = normalize(f_txt)
    li2t = img @ txt.T / temperature
    lt2i = txt @ img.T / temperature
    h = li2t.shape[0]

    def xent_first(v):
        m = v.max()
        lse = m + np.log(np.exp(v - m).sum())
        return -(v[0] - lse) / v.shape[0]

    total = 0.0
    for layer in range(h):
        row = scores[layer]
        pos = np.nonzero(row > t1)[0]
        neg = np.nonzero(row <= t2)[0]
        neg_i2t = li2t[layer][neg]
        neg_t2i = lt2i[layer][neg]
        loss_sep = 0.0
        for j in pos:
            new_i2t = np.concatenate([[li2t[layer, j]], neg_i2t])
            new_t2i = np.concatenate([[lt2i[layer, j]], neg_t2i])
            loss_sep += alpha * xent_first(new_i2t) + (1 - alpha) * xent_first(new_t2i)
        loss_sep /= len(pos)
        total += loss_sep
    return total / h


if __name__ == "__main__":
    key = jax.random.PRNGKey(0)
    N, D = 8, 32
    k1, k2, k3 = jax.random.split(key, 3)

    f_img = jax.random.normal(k1, (N, D), dtype=jnp.float32)
    f_txt = jax.random.normal(k2, (N, D), dtype=jnp.float32)
    scores = jax.random.uniform(k3, (N, N), dtype=jnp.float32)
    # guarantee at least one positive per row (PyTorch code divides by len(pos))
    scores = scores.at[jnp.arange(N), jnp.arange(N)].set(0.95)

    temperature = 0.1
    alpha_weight = 0.5
    threshold1, threshold2 = 0.7, 0.3

    loss = hierarchical_loss(f_img, f_txt, scores, temperature, alpha_weight,
                             threshold1, threshold2)
    loss = jax.block_until_ready(loss)

    ref = _reference_loss(np.array(f_img), np.array(f_txt), np.array(scores),
                          temperature, alpha_weight, threshold1, threshold2)
    # Tolerance covers the optional bf16 softplus path on v6e/v7x; matmuls stay in f32.
    assert abs(float(loss) - float(ref)) < 2e-2 * max(1.0, abs(float(ref))), (float(loss), ref)

    print("KERNEL_OK")
</pallas_src>

<mosaic_0001>
module attributes {stable_mosaic.version = 11 : i64} {
  func.func @_hier_loss_kernel(%arg0: i32, %arg1: memref<128x128xf32, #tpu.memory_space<vmem>>, %arg2: memref<128x128xf32, #tpu.memory_space<vmem>>, %arg3: memref<128x128xi8, #tpu.memory_space<vmem>>, %arg4: memref<1x8x128xf32, #tpu.memory_space<vmem>>, %arg5: memref<1x8x128xf32, #tpu.memory_space<vmem>>) attributes {dimension_semantics = [#tpu.dimension_semantics<parallel>], iteration_bounds = array<i64: 1>, scalar_prefetch = 0 : i64, scratch_operands = 0 : i64, tpu.core_type = #tpu.core_type<tc>, window_params = [{pipeline_mode = #tpu.pipeline_mode<synchronous>, transform_indices = @transform_0, window_bounds = array<i64: 128, 128>}, {pipeline_mode = #tpu.pipeline_mode<synchronous>, transform_indices = @transform_1, window_bounds = array<i64: 128, 128>}, {transform_indices = @transform_2, window_bounds = array<i64: 128, 128>}, {transform_indices = @transform_3, window_bounds = array<i64: 1, 8, 128>}, {transform_indices = @transform_4, window_bounds = array<i64: 1, 8, 128>}]} {
    %c128_i32 = arith.constant 128 : i32
    %0 = arith.muli %arg0, %c128_i32 : i32
    %1 = tpu.assume_multiple %0, 128 : i32
    %c0 = arith.constant 0 : index
    %c0_0 = arith.constant 0 : index
    %2 = vector.load %arg3[%c0, %c0_0] : memref<128x128xi8, #tpu.memory_space<vmem>>, vector<128x128xi8>
    %3 = arith.extsi %2 : vector<128x128xi8> to vector<128x128xi32>
    %c1_i32 = arith.constant 1 : i32
    %4 = vector.broadcast %c1_i32 : i32 to vector<128x128xi32>
    %5 = arith.andi %3, %4 : vector<128x128xi32>
    %c0_i32 = arith.constant 0 : i32
    %6 = vector.broadcast %c0_i32 : i32 to vector<128x128xi32>
    %7 = arith.cmpi sgt, %5, %6 : vector<128x128xi32>
    %c2_i32 = arith.constant 2 : i32
    %8 = vector.broadcast %c2_i32 : i32 to vector<128x128xi32>
    %9 = arith.andi %3, %8 : vector<128x128xi32>
    %c0_i32_1 = arith.constant 0 : i32
    %10 = vector.broadcast %c0_i32_1 : i32 to vector<128x128xi32>
    %11 = arith.cmpi sgt, %9, %10 : vector<128x128xi32>
    %12 = arith.extui %7 : vector<128x128xi1> to vector<128x128xi32>
    %13 = arith.sitofp %12 : vector<128x128xi32> to vector<128x128xf32>
    %cst = arith.constant dense<0.000000e+00> : vector<128xf32>
    %14 = vector.multi_reduction <add>, %13, %cst [1] : vector<128x128xf32> to vector<128xf32>
    %15 = vector.shape_cast %14 : vector<128xf32> to vector<128x1xf32>
    %16 = arith.extui %11 : vector<128x128xi1> to vector<128x128xi32>
    %17 = arith.sitofp %16 : vector<128x128xi32> to vector<128x128xf32>
    %cst_2 = arith.constant dense<0.000000e+00> : vector<128xf32>
    %18 = vector.multi_reduction <add>, %17, %cst_2 [1] : vector<128x128xf32> to vector<128xf32>
    %19 = vector.shape_cast %18 : vector<128xf32> to vector<128x1xf32>
    %cst_3 = arith.constant 1.000000e+00 : f32
    %20 = vector.broadcast %cst_3 : f32 to vector<128x1xf32>
    %21 = arith.addf %20, %19 : vector<128x1xf32>
    %cst_4 = arith.constant 1.000000e+00 : f32
    %22 = vector.broadcast %cst_4 : f32 to vector<128x1xf32>
    %23 = arith.maximumf %15, %22 : vector<128x1xf32>
    %24 = arith.mulf %21, %23 : vector<128x1xf32>
    %25 = tpu.reciprocal %24 : vector<128x1xf32> -> vector<128x1xf32>
    %26 = arith.index_cast %1 : i32 to index
    %c0_5 = arith.constant 0 : index
    %27 = vector.load %arg1[%26, %c0_5] : memref<128x128xf32, #tpu.memory_space<vmem>>, vector<128x128xf32>
    %c0_6 = arith.constant 0 : index
    %c0_7 = arith.constant 0 : index
    %28 = vector.load %arg2[%c0_6, %c0_7] : memref<128x128xf32, #tpu.memory_space<vmem>>, vector<128x128xf32>
    %cst_8 = arith.constant dense<0.000000e+00> : vector<128x128xf32>
    %29 = tpu.matmul %27, %28, %cst_8 {dimension_numbers = #tpu.dot_dimension_numbers<[1], [1], [0], [0], [0, 0, 1, 0], [], []>} : vector<128x128xf32>, vector<128x128xf32>, vector<128x128xf32> -> vector<128x128xf32>
    %cst_9 = arith.constant -1.000000e+30 : f32
    %30 = vector.broadcast %cst_9 : f32 to vector<128x128xf32>
    %31 = arith.select %11, %29, %30 : vector<128x128xi1>, vector<128x128xf32>
    %cst_10 = arith.constant dense<0xFF800000> : vector<128xf32>
    %32 = vector.multi_reduction <maximumf>, %31, %cst_10 [1] : vector<128x128xf32> to vector<128xf32>
    %33 = vector.shape_cast %32 : vector<128xf32> to vector<128x1xf32>
    %34 = vector.broadcast %33 : vector<128x1xf32> to vector<128x128xf32>
    %35 = arith.subf %31, %34 : vector<128x128xf32>
    %36 = math.exp %35 : vector<128x128xf32>
    %cst_11 = arith.constant dense<0.000000e+00> : vector<128xf32>
    %37 = vector.multi_reduction <add>, %36, %cst_11 [1] : vector<128x128xf32> to vector<128xf32>
    %38 = vector.shape_cast %37 : vector<128xf32> to vector<128x1xf32>
    %cst_12 = arith.constant 0.000000e+00 : f32
    %39 = vector.broadcast %cst_12 : f32 to vector<128x1xf32>
    %40 = arith.cmpf ogt, %19, %39 : vector<128x1xf32>
    %41 = math.log %38 : vector<128x1xf32>
    %42 = arith.addf %33, %41 : vector<128x1xf32>
    %cst_13 = arith.constant -1.000000e+30 : f32
    %43 = vector.broadcast %cst_13 : f32 to vector<128x1xf32>
    %44 = arith.select %40, %42, %43 : vector<128x1xi1>, vector<128x1xf32>
    %45 = vector.broadcast %44 : vector<128x1xf32> to vector<128x128xf32>
    %46 = arith.subf %29, %45 : vector<128x128xf32>
    %47 = math.absf %46 : vector<128x128xf32>
    %cst_14 = arith.constant 0.000000e+00 : f32
    %48 = vector.broadcast %cst_14 : f32 to vector<128x128xf32>
    %49 = arith.subf %48, %47 : vector<128x128xf32>
    %50 = arith.truncf %49 : vector<128x128xf32> to vector<128x128xbf16>
    %51 = math.exp %50 : vector<128x128xbf16>
    %cst_15 = arith.constant 1.000000e+00 : bf16
    %52 = vector.broadcast %cst_15 : bf16 to vector<128x128xbf16>
    %53 = arith.addf %52, %51 : vector<128x128xbf16>
    %54 = math.log %53 : vector<128x128xbf16>
    %55 = arith.extf %54 : vector<128x128xbf16> to vector<128x128xf32>
    %cst_16 = arith.constant 0.000000e+00 : f32
    %56 = vector.broadcast %cst_16 : f32 to vector<128x128xf32>
    %57 = arith.subf %56, %46 : vector<128x128xf32>
    %cst_17 = arith.constant 0.000000e+00 : f32
    %58 = vector.broadcast %cst_17 : f32 to vector<128x128xf32>
    %59 = arith.maximumf %57, %58 : vector<128x128xf32>
    %60 = arith.addf %59, %55 : vector<128x128xf32>
    %cst_18 = arith.constant 0.000000e+00 : f32
    %61 = vector.broadcast %cst_18 : f32 to vector<128x128xf32>
    %62 = arith.select %7, %60, %61 : vector<128x128xi1>, vector<128x128xf32>
    %cst_19 = arith.constant dense<0.000000e+00> : vector<128xf32>
    %63 = vector.multi_reduction <add>, %62, %cst_19 [1] : vector<128x128xf32> to vector<128xf32>
    %64 = vector.shape_cast %63 : vector<128xf32> to vector<128x1xf32>
    %65 = arith.index_cast %1 : i32 to index
    %c0_20 = arith.constant 0 : index
    %66 = vector.load %arg2[%65, %c0_20] : memref<128x128xf32, #tpu.memory_space<vmem>>, vector<128x128xf32>
    %c0_21 = arith.constant 0 : index
    %c0_22 = arith.constant 0 : index
    %67 = vector.load %arg1[%c0_21, %c0_22] : memref<128x128xf32, #tpu.memory_space<vmem>>, vector<128x128xf32>
    %cst_23 = arith.constant dense<0.000000e+00> : vector<128x128xf32>
    %68 = tpu.matmul %66, %67, %cst_23 {dimension_numbers = #tpu.dot_dimension_numbers<[1], [1], [0], [0], [0, 0, 1, 0], [], []>} : vector<128x128xf32>, vector<128x128xf32>, vector<128x128xf32> -> vector<128x128xf32>
    %cst_24 = arith.constant -1.000000e+30 : f32
    %69 = vector.broadcast %cst_24 : f32 to vector<128x128xf32>
    %70 = arith.select %11, %68, %69 : vector<128x128xi1>, vector<128x128xf32>
    %cst_25 = arith.constant dense<0xFF800000> : vector<128xf32>
    %71 = vector.multi_reduction <maximumf>, %70, %cst_25 [1] : vector<128x128xf32> to vector<128xf32>
    %72 = vector.shape_cast %71 : vector<128xf32> to vector<128x1xf32>
    %73 = vector.broadcast %72 : vector<128x1xf32> to vector<128x128xf32>
    %74 = arith.subf %70, %73 : vector<128x128xf32>
    %75 = math.exp %74 : vector<128x128xf32>
    %cst_26 = arith.constant dense<0.000000e+00> : vector<128xf32>
    %76 = vector.multi_reduction <add>, %75, %cst_26 [1] : vector<128x128xf32> to vector<128xf32>
    %77 = vector.shape_cast %76 : vector<128xf32> to vector<128x1xf32>
    %cst_27 = arith.constant 0.000000e+00 : f32
    %78 = vector.broadcast %cst_27 : f32 to vector<128x1xf32>
    %79 = arith.cmpf ogt, %19, %78 : vector<128x1xf32>
    %80 = math.log %77 : vector<128x1xf32>
    %81 = arith.addf %72, %80 : vector<128x1xf32>
    %cst_28 = arith.constant -1.000000e+30 : f32
    %82 = vector.broadcast %cst_28 : f32 to vector<128x1xf32>
    %83 = arith.select %79, %81, %82 : vector<128x1xi1>, vector<128x1xf32>
    %84 = vector.broadcast %83 : vector<128x1xf32> to vector<128x128xf32>
    %85 = arith.subf %68, %84 : vector<128x128xf32>
    %86 = math.absf %85 : vector<128x128xf32>
    %cst_29 = arith.constant 0.000000e+00 : f32
    %87 = vector.broadcast %cst_29 : f32 to vector<128x128xf32>
    %88 = arith.subf %87, %86 : vector<128x128xf32>
    %89 = arith.truncf %88 : vector<128x128xf32> to vector<128x128xbf16>
    %90 = math.exp %89 : vector<128x128xbf16>
    %cst_30 = arith.constant 1.000000e+00 : bf16
    %91 = vector.broadcast %cst_30 : bf16 to vector<128x128xbf16>
    %92 = arith.addf %91, %90 : vector<128x128xbf16>
    %93 = math.log %92 : vector<128x128xbf16>
    %94 = arith.extf %93 : vector<128x128xbf16> to vector<128x128xf32>
    %cst_31 = arith.constant 0.000000e+00 : f32
    %95 = vector.broadcast %cst_31 : f32 to vector<128x128xf32>
    %96 = arith.subf %95, %85 : vector<128x128xf32>
    %cst_32 = arith.constant 0.000000e+00 : f32
    %97 = vector.broadcast %cst_32 : f32 to vector<128x128xf32>
    %98 = arith.maximumf %96, %97 : vector<128x128xf32>
    %99 = arith.addf %98, %94 : vector<128x128xf32>
    %cst_33 = arith.constant 0.000000e+00 : f32
    %100 = vector.broadcast %cst_33 : f32 to vector<128x128xf32>
    %101 = arith.select %7, %99, %100 : vector<128x128xi1>, vector<128x128xf32>
    %cst_34 = arith.constant dense<0.000000e+00> : vector<128xf32>
    %102 = vector.multi_reduction <add>, %101, %cst_34 [1] : vector<128x128xf32> to vector<128xf32>
    %103 = vector.shape_cast %102 : vector<128xf32> to vector<128x1xf32>
    %104 = arith.mulf %64, %25 : vector<128x1xf32>
    %105 = vector.shape_cast %104 : vector<128x1xf32> to vector<1x128x1xf32>
    %cst_35 = arith.constant dense<0.000000e+00> : vector<1xf32>
    %106 = vector.multi_reduction <add>, %105, %cst_35 [1, 2] : vector<1x128x1xf32> to vector<1xf32>
    %107 = vector.shape_cast %106 : vector<1xf32> to vector<1x1x1xf32>
    %108 = vector.extract %107[0, 0, 0] : f32 from vector<1x1x1xf32>
    %109 = vector.broadcast %108 : f32 to vector<1x8x128xf32>
    %c0_36 = arith.constant 0 : index
    %c0_37 = arith.constant 0 : index
    %c0_38 = arith.constant 0 : index
    %110 = vector.load %arg4[%c0_36, %c0_37, %c0_38] : memref<1x8x128xf32, #tpu.memory_space<vmem>>, vector<1x8x128xf32>
    tpu.vector_store %arg4[%c0_36, %c0_37, %c0_38], %109 {strides = array<i32>} : memref<1x8x128xf32, #tpu.memory_space<vmem>>, vector<1x8x128xf32>,
    %111 = arith.mulf %103, %25 : vector<128x1xf32>
    %112 = vector.shape_cast %111 : vector<128x1xf32> to vector<1x128x1xf32>
    %cst_39 = arith.constant dense<0.000000e+00> : vector<1xf32>
    %113 = vector.multi_reduction <add>, %112, %cst_39 [1, 2] : vector<1x128x1xf32> to vector<1xf32>
    %114 = vector.shape_cast %113 : vector<1xf32> to vector<1x1x1xf32>
    %115 = vector.extract %114[0, 0, 0] : f32 from vector<1x1x1xf32>
    %116 = vector.broadcast %115 : f32 to vector<1x8x128xf32>
    %c0_40 = arith.constant 0 : index
    %c0_41 = arith.constant 0 : index
    %c0_42 = arith.constant 0 : index
    %117 = vector.load %arg5[%c0_40, %c0_41, %c0_42] : memref<1x8x128xf32, #tpu.memory_space<vmem>>, vector<1x8x128xf32>
    tpu.vector_store %arg5[%c0_40, %c0_41, %c0_42], %116 {strides = array<i32>} : memref<1x8x128xf32, #tpu.memory_space<vmem>>, vector<1x8x128xf32>,
    return
  }
  func.func @transform_0(%arg0: i32) -> (i32, i32) {
    %c0_i32 = arith.constant 0 : i32
    %c0_i32_0 = arith.constant 0 : i32
    %c0_i32_1 = arith.constant 0 : i32
    return %c0_i32, %c0_i32_0 : i32, i32
  }
  func.func @transform_1(%arg0: i32) -> (i32, i32) {
    %c0_i32 = arith.constant 0 : i32
    %c0_i32_0 = arith.constant 0 : i32
    %c0_i32_1 = arith.constant 0 : i32
    return %c0_i32, %c0_i32_0 : i32, i32
  }
  func.func @transform_2(%arg0: i32) -> (i32, i32) {
    %c0_i32 = arith.constant 0 : i32
    %c0_i32_0 = arith.constant 0 : i32
    return %arg0, %c0_i32 : i32, i32
  }
  func.func @transform_3(%arg0: i32) -> (i32, i32, i32) {
    %c0_i32 = arith.constant 0 : i32
    %c0_i32_0 = arith.constant 0 : i32
    %c0_i32_1 = arith.constant 0 : i32
    return %arg0, %c0_i32, %c0_i32_0 : i32, i32, i32
  }
  func.func @transform_4(%arg0: i32) -> (i32, i32, i32) {
    %c0_i32 = arith.constant 0 : i32
    %c0_i32_0 = arith.constant 0 : i32
    %c0_i32_1 = arith.constant 0 : i32
    return %arg0, %c0_i32, %c0_i32_0 : i32, i32, i32
  }
}

</mosaic_0001>

<bundles_post_ra>
// kernel: tpu_custom_call.1
= control target key start
LH: loop header
LB: loop body
LE: loop exit
PB: predicated region body
PF: predicated region fallthrough
CT: control target
= control target key end

     0   :  { %10 = vsyncpa [#allocation3], 0  ;;  %s3684_s0 = inlined_call_operand.hbm [shape: f32[128,128], index: 0, kind: input, shape index: {}]   ;;  %s3685_s1 = inlined_call_operand.hbm [shape: f32[128,128], index: 1, kind: input, shape index: {}]   ;;  %s3686_s2 = inlined_call_operand.hbm [shape: s8[128,128], index: 2, kind: input, shape index: {}]   ;;  %s3687_s3 = inlined_call_operand.hbm [shape: f32[1,8,128], index: 3, kind: output, shape index: {0}]   ;;  %s3688_s4 = inlined_call_operand.hbm [shape: f32[1,8,128], index: 4, kind: output, shape index: {1}]  }
   0x1   :  { %11 = vsyncpa [#allocation6], 0 }
   0x2   :  { %12 = vsyncpa [#allocation4], 0 }
   0x3   :  { %13 = vsyncpa [#allocation10], 0  ;;  %s2314_s15 = smov [#allocation5]   ;;  %s2315_s17 = smov [#allocation2]  }
   0x4   :  { %s31_s16 = sshll.u32 %s2314_s15, 4  ;;  %s19_s18 = sshll.u32 %s2315_s17, 4  ;;  %s32_s16 = int_to_ptr.vmem [resolvable:$true] %s31_s16  ;;  %s2347_s18 = int_to_ptr.vmem [resolvable:$true] %s19_s18 }
   0x5   :  { %s2196_s21 = scalar_lea.hbm %s3685_s1, 2048 }
   0x6   :  { %p2197_p0 = scmp.ne.s32.totalorder %s3685_s1, %s2196_s21  ;;  %p2200_p1 = scmp.lt.u32.totalorder %s2196_s21, %s3685_s1 }
   0x8   :  { %p2202_p2 = pnand %p2200_p1, %p2197_p0 }
   0xa   :  { %2205 = shalt.err (!%p2202_p2)
}
   0xb   :  { %s2206_s26 = scalar_lea.vmem %s32_s16, 2048  ;;  %p2211_p4 = scmp.lt.s32.totalorder %s32_s16, %s32_s16 }
   0xc   :  { %p2207_p3 = scmp.ne.s32.totalorder %s32_s16, %s2206_s26  ;;  %p2212_p5 = scmp.lt.s32.totalorder %s2206_s26, %s2206_s26 }
   0xe   :  { %p2213_p6 = por %p2212_p5, %p2211_p4 }
  0x10   :  { %p2214_p7 = pnand %p2213_p6, %p2207_p3 }
  0x12   :  { %2217 = shalt.err (!%p2214_p7)
}
  0x13   :  { %s2316_s27 = smov 128   ;;  %s2317_s28 = smov 8  }
  0x14   :  { %37 = dma.hbm_to_vmem [thread:$0]  %s3685_s1, 2048, %s32_s16, [#allocation6], %s2316_s27, %s2316_s27, %s2317_s28  }
  0x15   :  { %s2218_s7 = scalar_lea.hbm %s3684_s0, 2048 }
  0x16   :  { %p2219_p8 = scmp.ne.s32.totalorder %s3684_s0, %s2218_s7  ;;  %p2222_p9 = scmp.lt.u32.totalorder %s2218_s7, %s3684_s0 }
  0x18   :  { %p2224_p10 = pnand %p2222_p9, %p2219_p8 }
  0x1a   :  { %2227 = shalt.err (!%p2224_p10)
}
  0x1b   :  { %s2228_s12 = scalar_lea.vmem %s2347_s18, 2048  ;;  %p2233_p12 = scmp.lt.s32.totalorder %s2347_s18, %s2347_s18 }
  0x1c   :  { %p2229_p11 = scmp.ne.s32.totalorder %s2347_s18, %s2228_s12  ;;  %p2234_p13 = scmp.lt.s32.totalorder %s2228_s12, %s2228_s12 }
  0x1e   :  { %p2235_p0 = por %p2234_p13, %p2233_p12 }
  0x20   :  { %p2236_p1 = pnand %p2235_p0, %p2229_p11 }
  0x22   :  { %2239 = shalt.err (!%p2236_p1)
}
  0x23   :  { %25 = dma.hbm_to_vmem [thread:$0]  %s3684_s0, 2048, %s2347_s18, [#allocation3], %s2316_s27, %s2316_s27, %s2317_s28  }
  0x24   :  { %s2318_s14 = smov [#allocation7]   ;;  %s2240_s19 = scalar_lea.hbm %s3686_s2, 512 }
  0x25   :  { %s43_s15 = sshll.u32 %s2318_s14, 4  ;;  %p2241_p2 = scmp.ne.s32.totalorder %s3686_s2, %s2240_s19  ;;  %s44_s15 = int_to_ptr.vmem [resolvable:$true] %s43_s15 }
  0x26   :  { %p2244_p3 = scmp.lt.u32.totalorder %s2240_s19, %s3686_s2 }
  0x28   :  { %p2246_p4 = pnand %p2244_p3, %p2241_p2 }
  0x2a   :  { %2249 = shalt.err (!%p2246_p4)
}
  0x2b   :  { %s2250_s24 = scalar_lea.vmem %s44_s15, 512  ;;  %p2255_p6 = scmp.lt.s32.totalorder %s44_s15, %s44_s15 }
  0x2c   :  { %p2251_p5 = scmp.ne.s32.totalorder %s44_s15, %s2250_s24  ;;  %p2256_p7 = scmp.lt.s32.totalorder %s2250_s24, %s2250_s24 }
  0x2e   :  { %p2257_p8 = por %p2256_p7, %p2255_p6 }
  0x30   :  { %p2258_p9 = pnand %p2257_p8, %p2251_p5 }
  0x32   :  { %2261 = shalt.err (!%p2258_p9)
}
  0x33   :  { %49 = dma.hbm_to_vmem [thread:$0]  %s3686_s2, 512, %s44_s15, [#allocation6], %s2316_s27, %s2316_s27, %s2317_s28  }
  0x34   :  { %2306 = dma.done.wait [#allocation3], 2048  }
  0x35   :  { %2307 = vsyncadd [#allocation3], 4294965248 }
  0x36   :  { %2308 = dma.done.wait [#allocation6], 2560  }
  0x37   :  { %2309 = vsyncadd [#allocation6], 4294964736  ;;  %v354_v0 = vld [vmem:[#allocation5] sm:$0xff]  ;;  %v2399_v1 = vld [vmem:[#allocation5 + $0x8] sm:$0xff]  ;;  %s2320_s2 = smov [#allocation8]   ;;  %s2321_s27 = smov [#allocation9]  }
  0x38   :  { %v964_v2 = vld [vmem:[#allocation2] sm:$0xff]  ;;  %v1896_v3 = vpack.c.bf16 %v2399_v1, %v354_v0  ;;  %v2402_v4 = vld [vmem:[#allocation2 + $0x8] sm:$0xff]  ;;  %v2404_v5 = vld [vmem:[#allocation5 + $0x10] sm:$0xff]  ;;  %1872 = vmatprep.mubr.f32.mxu1 %v354_v0  ;;  %s1664_s25 = sshll.u32 %s2320_s2, 4  ;;  %s1674_s28 = sshll.u32 %s2321_s27, 4  ;;  %s1665_s25 = int_to_ptr.vmem [resolvable:$true] %s1664_s25  ;;  %s1675_s28 = int_to_ptr.vmem [resolvable:$true] %s1674_s28 }
  0x39   :  { %v2406_v6 = vld [vmem:[#allocation5 + $0x18] sm:$0xff]  ;;  %1816 = vmatprep.mubr.f32.mxu0 %v964_v2  ;;  %v1928_v7 = vpack.c.bf16 %v2402_v4, %v964_v2  ;;  %v2411_v9 = vld [vmem:[#allocation2 + $0x10] sm:$0xff]  ;;  %v2417_v12 = vld [vmem:[#allocation5 + $0x20] sm:$0xff]  ;;  %s2262_s29 = scalar_lea.vmem %s1665_s25, 128  ;;  %p2267_p11 = scmp.lt.s32.totalorder %s1665_s25, %s1665_s25 }
  0x3a   :  { %v1900_v8 = vpack.c.bf16 %v2406_v6, %v2404_v5  ;;  %v2413_v10 = vld [vmem:[#allocation2 + $0x18] sm:$0xff]  ;;  %1897 = vmatprep.subr.bf16.mxu0 %v1896_v3  ;;  %v2419_v13 = vld [vmem:[#allocation5 + $0x28] sm:$0xff]  ;;  %v2421_v14 = vld [vmem:[#allocation2 + $0x20] sm:$0xff]  ;;  %p2263_p10 = scmp.ne.s32.totalorder %s1665_s25, %s2262_s29  ;;  %p2268_p12 = scmp.lt.s32.totalorder %s2262_s29, %s2262_s29 }
  0x3b   :  { %v1932_v11 = vpack.c.bf16 %v2413_v10, %v2411_v9  ;;  %1929 = vmatprep.subr.bf16.mxu1 %v1928_v7  ;;  %1899 = vmatpush3.bf16.xpose.msra.mxu0 %v1896_v3  ;;  %v2423_v15 = vld [vmem:[#allocation2 + $0x28] sm:$0xff]  ;;  %v1904_v16 = vpack.c.bf16 %v2419_v13, %v2417_v12  ;;  %v360_v18 = vld [vmem:[#allocation5 + $0x30] sm:$0xff]  ;;  %v2429_v19 = vld [vmem:[#allocation5 + $0x38] sm:$0xff] }
  0x3c   :  { %1931 = vmatpush3.bf16.xpose.msra.mxu1 %v1928_v7  ;;  %1901 = vmatprep.subr.bf16.mxu0 %v1900_v8  ;;  %v1936_v17 = vpack.c.bf16 %v2423_v15, %v2421_v14  ;;  %v970_v20 = vld [vmem:[#allocation2 + $0x30] sm:$0xff]  ;;  %v971_v21 = vld [vmem:[#allocation2 + $0x38] sm:$0xff]  ;;  %v1908_v22 = vpack.c.bf16 %v2429_v19, %v360_v18  ;;  %v362_v24 = vld [vmem:[#allocation5 + $0x40] sm:$0xff]  ;;  %p2269_p13 = por %p2268_p12, %p2267_p11 }
  0x3d   :  { %1933 = vmatprep.subr.bf16.mxu1 %v1932_v11  ;;  %v1940_v23 = vpack.c.bf16 %v971_v21, %v970_v20  ;;  %v363_v25 = vld [vmem:[#allocation5 + $0x48] sm:$0xff]  ;;  %v972_v26 = vld [vmem:[#allocation2 + $0x40] sm:$0xff]  ;;  %v364_v30 = vld [vmem:[#allocation5 + $0x50] sm:$0xff] }
  0x3e   :  { %v973_v27 = vld [vmem:[#allocation2 + $0x48] sm:$0xff]  ;;  %v1912_v28 = vpack.c.bf16 %v363_v25, %v362_v24  ;;  %v365_v31 = vld [vmem:[#allocation5 + $0x58] sm:$0xff]  ;;  %v974_v32 = vld [vmem:[#allocation2 + $0x50] sm:$0xff]  ;;  %p2270_p0 = pnand %p2269_p13, %p2263_p10 }
  0x3f   :  { %v1944_v29 = vpack.c.bf16 %v973_v27, %v972_v26  ;;  %v975_v33 = vld [vmem:[#allocation2 + $0x58] sm:$0xff]  ;;  %v1916_v34 = vpack.c.bf16 %v365_v31, %v364_v30  ;;  %v366_v36 = vld [vmem:[#allocation5 + $0x60] sm:$0xff]  ;;  %v367_v37 = vld [vmem:[#allocation5 + $0x68] sm:$0xff] }
  0x40   :  { %v1948_v35 = vpack.c.bf16 %v975_v33, %v974_v32  ;;  %v976_v38 = vld [vmem:[#allocation2 + $0x60] sm:$0xff]  ;;  %v977_v39 = vld [vmem:[#allocation2 + $0x68] sm:$0xff]  ;;  %v1920_v40 = vpack.c.bf16 %v367_v37, %v366_v36  ;;  %v368_v42 = vld [vmem:[#allocation5 + $0x70] sm:$0xff] }
  0x41   :  { %v1952_v41 = vpack.c.bf16 %v977_v39, %v976_v38  ;;  %v369_v43 = vld [vmem:[#allocation5 + $0x78] sm:$0xff]  ;;  %v978_v44 = vld [vmem:[#allocation2 + $0x70] sm:$0xff]  ;;  %v2443_v48 = vld [vmem:[#allocation7] sm:$0xff] }
  0x42   :  { %v979_v45 = vld [vmem:[#allocation2 + $0x78] sm:$0xff]  ;;  %v1924_v46 = vpack.c.bf16 %v369_v43, %v368_v42  ;;  %v3698_v49 = vunpack.c.1.s8 %v2443_v48  ;;  %v3697_v51 = vunpack.c.0.s8 %v2443_v48  ;;  %v3695_v52 = vunpack.c.2.s8 %v2443_v48  ;;  %v2477_v61 = vld [vmem:[#allocation7 + $0x8] sm:$0xff] }
  0x43   :  { %1903 = vmatpush3.bf16.xpose.msra.mxu0 %v1900_v8  ;;  %v1956_v47 = vpack.c.bf16 %v979_v45, %v978_v44  ;;  %v3696_v53 = vunpack.c.3.s8 %v2443_v48  ;;  %v3693_v2 = vunpack.c.0.s8 %v2477_v61 }
  0x44   :  { %1935 = vmatpush3.bf16.xpose.msra.mxu1 %v1932_v11  ;;  %1905 = vmatprep.subr.bf16.mxu0 %v1904_v16  ;;  %v2448_v50 = vand.u32 2, %v3698_v49  ;;  %v2456_v54 = vand.u32 2, %v3697_v51  ;;  %v2462_v56 = vand.u32 2, %v3695_v52 }
  0x45   :  { %1937 = vmatprep.subr.bf16.mxu1 %v1936_v17  ;;  %v2475_v60 = vand.u32 2, %v3696_v53  ;;  %v2527_v11 = vand.u32 2, %v3693_v2 }
  0x46   :  { %vm130_vm0 = vcmp.gt.s32.totalorder %v2448_v50, 0  ;;  %vm129_vm1 = vcmp.gt.s32.totalorder %v2456_v54, 0  ;;  %vm131_vm2 = vcmp.gt.s32.totalorder %v2462_v56, 0 }
  0x47   :  { %vm132_vm3 = vcmp.gt.s32.totalorder %v2475_v60, 0  ;;  %vm133_vm4 = vcmp.gt.s32.totalorder %v2527_v11, 0 }
  0x4b   :  { %1907 = vmatpush3.bf16.xpose.msra.mxu0 %v1904_v16 }
  0x4c   :  { %1939 = vmatpush3.bf16.xpose.msra.mxu1 %v1936_v17  ;;  %1909 = vmatprep.subr.bf16.mxu0 %v1908_v22 }
  0x4d   :  { %1941 = vmatprep.subr.bf16.mxu1 %v1940_v23 }
  0x53   :  { %1911 = vmatpush3.bf16.xpose.msra.mxu0 %v1908_v22 }
  0x54   :  { %1943 = vmatpush3.bf16.xpose.msra.mxu1 %v1940_v23  ;;  %1913 = vmatprep.subr.bf16.mxu0 %v1912_v28 }
  0x55   :  { %1945 = vmatprep.subr.bf16.mxu1 %v1944_v29 }
  0x5b   :  { %1915 = vmatpush3.bf16.xpose.msra.mxu0 %v1912_v28 }
  0x5c   :  { %1947 = vmatpush3.bf16.xpose.msra.mxu1 %v1944_v29  ;;  %1917 = vmatprep.subr.bf16.mxu0 %v1916_v34 }
  0x5d   :  { %1949 = vmatprep.subr.bf16.mxu1 %v1948_v35 }
  0x63   :  { %1919 = vmatpush3.bf16.xpose.msra.mxu0 %v1916_v34 }
  0x64   :  { %1951 = vmatpush3.bf16.xpose.msra.mxu1 %v1948_v35  ;;  %1921 = vmatprep.subr.bf16.mxu0 %v1920_v40 }
  0x65   :  { %1953 = vmatprep.subr.bf16.mxu1 %v1952_v41 }
  0x6b   :  { %1923 = vmatpush3.bf16.xpose.msra.mxu0 %v1920_v40 }
  0x6c   :  { %1955 = vmatpush3.bf16.xpose.msra.mxu1 %v1952_v41  ;;  %1925 = vmatprep.subr.bf16.mxu0 %v1924_v46 }
  0x6d   :  { %1957 = vmatprep.subr.bf16.mxu1 %v1956_v47 }
  0x73   :  { %1927 = vmatpush3.bf16.xpose.msra.mxu0 %v1924_v46 }
  0x74   :  { %1959 = vmatpush3.bf16.xpose.msra.mxu1 %v1956_v47 }
  0x7a   :  { %1817 = vmatmul.mubr.f32.vlgmr.msra.gmra.mrb[0].mxu0 %v2402_v4 }
  0x7b   :  { %1873 = vmatmul.mubr.f32.vlgmr.msra.gmra.mrb[0].mxu1 %v2399_v1  ;;  %1819 = vmatprep.mubr.f32.mxu0 %v2411_v9 }
  0x7c   :  { %1875 = vmatprep.mubr.f32.mxu1 %v2404_v5 }
  0x7e   :  { %1820 = vmatmul.mubr.f32.gmra.mrb[2].mxu0 %v2413_v10 }
  0x7f   :  { %1876 = vmatmul.mubr.f32.gmra.mrb[2].mxu1 %v2406_v6  ;;  %1822 = vmatprep.mubr.f32.mxu0 %v2421_v14  ;;  %v3694_v6 = vunpack.c.1.s8 %v2477_v61 }
  0x80   :  { %1878 = vmatprep.mubr.f32.mxu1 %v2417_v12 }
  0x82   :  { %1823 = vmatmul.mubr.f32.gmra.mrb[4].mxu0 %v2423_v15 }
  0x83   :  { %1879 = vmatmul.mubr.f32.gmra.mrb[4].mxu1 %v2419_v13  ;;  %1825 = vmatprep.mubr.f32.mxu0 %v970_v20  ;;  %v2533_v13 = vand.u32 2, %v3694_v6 }
  0x84   :  { %1881 = vmatprep.mubr.f32.mxu1 %v360_v18 }
  0x85   :  { %vm134_vm5 = vcmp.gt.s32.totalorder %v2533_v13, 0 }
  0x86   :  { %1826 = vmatmul.mubr.f32.gmra.mrb[6].mxu0 %v971_v21  ;;  %v3692_v21 = vunpack.c.3.s8 %v2477_v61 }
  0x87   :  { %1882 = vmatmul.mubr.f32.gmra.mrb[6].mxu1 %v2429_v19  ;;  %1828 = vmatprep.mubr.f32.mxu0 %v972_v26  ;;  %v3689_v19 = vunpack.c.2.s8 %v2477_v61 }
  0x88   :  { %1884 = vmatprep.mubr.f32.mxu1 %v362_v24  ;;  %v2583_v28 = vand.u32 2, %v3692_v21 }
  0x89   :  { %v2577_v26 = vand.u32 2, %v3689_v19 }
  0x8a   :  { %1829 = vmatmul.mubr.f32.gmra.mrb[8].mxu0 %v973_v27  ;;  %vm136_vm7 = vcmp.gt.s32.totalorder %v2583_v28, 0 }
  0x8b   :  { %1885 = vmatmul.mubr.f32.gmra.mrb[8].mxu1 %v363_v25  ;;  %1831 = vmatprep.mubr.f32.mxu0 %v974_v32  ;;  %vm135_vm6 = vcmp.gt.s32.totalorder %v2577_v26, 0 }
  0x8c   :  { %1887 = vmatprep.mubr.f32.mxu1 %v364_v30  ;;  %v2587_v30 = vld [vmem:[#allocation7 + $0x10] sm:$0xff] }
  0x8d   :  { %v3690_v35 = vunpack.c.0.s8 %v2587_v30  ;;  %v3800_v6 = vunpack.c.2.s8 %v2587_v30 }
  0x8e   :  { %1832 = vmatmul.mubr.f32.gmra.mrb[10].mxu0 %v975_v33 }
  0x8f   :  { %1888 = vmatmul.mubr.f32.gmra.mrb[10].mxu1 %v365_v31  ;;  %1834 = vmatprep.mubr.f32.mxu0 %v976_v38 }
  0x90   :  { %1890 = vmatprep.mubr.f32.mxu1 %v366_v36 }
  0x92   :  { %1835 = vmatmul.mubr.f32.gmra.mrb[12].mxu0 %v977_v39 }
  0x93   :  { %1891 = vmatmul.mubr.f32.gmra.mrb[12].mxu1 %v367_v37  ;;  %1837 = vmatprep.mubr.f32.mxu0 %v978_v44  ;;  %v3691_v37 = vunpack.c.1.s8 %v2587_v30 }
  0x94   :  { %1893 = vmatprep.mubr.f32.mxu1 %v368_v42 }
  0x96   :  { %1838 = vmatmul.mubr.f32.gmra.mrb[14].mxu0 %v979_v45  ;;  %v2637_v45 = vand.u32 2, %v3691_v37 }
  0x97   :  { %1894 = vmatmul.mubr.f32.gmra.mrb[14].mxu1 %v369_v43  ;;  %v2631_v43 = vand.u32 2, %v3690_v35 }
  0x98   :  { %vm138_vm9 = vcmp.gt.s32.totalorder %v2637_v45, 0 }
  0x99   :  { %vm137_vm8 = vcmp.gt.s32.totalorder %v2631_v43, 0 }
 0x14d   :  { %v2458_v55 = vpop.f32.mrb[0].mxu0 }
 0x14e   :  { %v2464_v57 = vpop.f32.mrb[0].mxu1  ;;  %v2466_v58 = vpop.f32.mrb[1].mxu0  ;;  %v2471_v59 = vsel %vm130_vm0, %v2458_v55, -1e+30 }
 0x14f   :  { %v2482_v62 = vsel %vm130_vm0, %v2464_v57, -1e+30  ;;  %533 = vmax.xlane.f32.xlu0 %v2471_v59  ;;  %v2485_v63 = vpop.f32.mrb[1].mxu1  ;;  %v2501_v3 = vsel %vm129_vm1, %v2466_v58, -1e+30 }
 0x150   :  { %1143 = vmax.xlane.f32.xlu1 %v2482_v62  ;;  %v2492_v0 = vsel %vm129_vm1, %v2485_v63, -1e+30 }
 0x151   :  { %v2494_v1 = vpop.f32.mrb[2].mxu0 }
 0x152   :  { %v2503_v4 = vpop.f32.mrb[3].mxu0  ;;  %v2506_v5 = vpop.f32.mrb[2].mxu1  ;;  %v2521_v9 = vsel %vm132_vm3, %v2494_v1, -1e+30 }
 0x153   :  { %3775 = vst [vmem:[#allocation15_spill] sm:$0xff] %v2506_v5  ;;  %531 = vmax.xlane.f32.xlu0 %v2501_v3  ;;  %v2510_v7 = vpop.f32.mrb[3].mxu1  ;;  %v2516_v8 = vsel %vm131_vm2, %v2503_v4, -1e+30  ;;  %v2549_v17 = vsel %vm132_vm3, %v2506_v5, -1e+30 }
 0x154   :  { %3776 = vst [vmem:[#allocation16_spill] sm:$0xff] %v2510_v7  ;;  %1141 = vmax.xlane.f32.xlu1 %v2492_v0  ;;  %v2544_v16 = vsel %vm131_vm2, %v2510_v7, -1e+30 }
 0x155   :  { %v2523_v10 = vpop.f32.mrb[4].mxu0 }
 0x156   :  { %v2529_v12 = vpop.f32.mrb[5].mxu0  ;;  %v2535_v14 = vpop.f32.mrb[4].mxu1  ;;  %v2573_v25 = vsel %vm134_vm5, %v2523_v10, -1e+30 }
 0x157   :  { %3777 = vst [vmem:[#allocation17_spill] sm:$0xff] %v2529_v12  ;;  %3778 = vst [vmem:[#allocation18_spill] sm:$0xff] %v2535_v14  ;;  %535 = vmax.xlane.f32.xlu0 %v2516_v8  ;;  %v2538_v15 = vpop.f32.mrb[5].mxu1  ;;  %v2568_v24 = vsel %vm133_vm4, %v2529_v12, -1e+30 }
 0x158   :  { %3779 = vst [vmem:[#allocation19_spill] sm:$0xff] %v2538_v15  ;;  %537 = vmax.xlane.f32.xlu1 %v2521_v9  ;;  %v2598_v33 = vsel %vm133_vm4, %v2538_v15, -1e+30  ;;  %v2603_v34 = vsel %vm134_vm5, %v2535_v14, -1e+30 }
 0x159   :  { %v2552_v18 = vpop.f32.mrb[6].mxu0 }
 0x15a   :  { %3780 = vst [vmem:[#allocation20_spill] sm:$0xff] %v2552_v18  ;;  %v2556_v20 = vpop.f32.mrb[7].mxu0  ;;  %v2559_v22 = vpop.f32.mrb[6].mxu1  ;;  %v2627_v42 = vsel %vm136_vm7, %v2552_v18, -1e+30  ;;  %v2689_v18 = vld [vmem:[#allocation7 + $0x18] sm:$0xff] }
 0x15b   :  { %3781 = vst [vmem:[#allocation21_spill] sm:$0xff] %v2556_v20  ;;  %3782 = vst [vmem:[#allocation22_spill] sm:$0xff] %v2559_v22  ;;  %1145 = vmax.xlane.f32.xlu0 %v2544_v16  ;;  %v2562_v23 = vpop.f32.mrb[7].mxu1  ;;  %v2622_v41 = vsel %vm135_vm6, %v2556_v20, -1e+30 }
 0x15c   :  { %3783 = vst [vmem:[#allocation23_spill] sm:$0xff] %v2562_v23  ;;  %1147 = vmax.xlane.f32.xlu1 %v2549_v17  ;;  %v2650_v35 = vsel %vm135_vm6, %v2562_v23, -1e+30  ;;  %v2655_v37 = vsel %vm136_vm7, %v2559_v22, -1e+30  ;;  %v2683_v23 = vand.u32 2, %v3800_v6  ;;  %v3801_v22 = vunpack.c.3.s8 %v2587_v30 }
 0x15d   :  { %v2579_v27 = vpop.f32.mrb[8].mxu0 }
 0x15e   :  { %3784 = vst [vmem:[#allocation24_spill] sm:$0xff] %v2579_v27  ;;  %v2585_v29 = vpop.f32.mrb[9].mxu0  ;;  %v2589_v31 = vpop.f32.mrb[8].mxu1  ;;  %v2679_v21 = vsel %vm138_vm9, %v2579_v27, -1e+30  ;;  %v2687_v20 = vand.u32 2, %v3801_v22  ;;  %v3711_v22 = vunpack.c.0.s8 %v2689_v18  ;;  %v3712_v27 = vunpack.c.1.s8 %v2689_v18 }
 0x15f   :  { %3785 = vst [vmem:[#allocation25_spill] sm:$0xff] %v2585_v29  ;;  %3786 = vst [vmem:[#allocation26_spill] sm:$0xff] %v2589_v31  ;;  %539 = vmax.xlane.f32.xlu0 %v2568_v24  ;;  %v2592_v32 = vpop.f32.mrb[9].mxu1  ;;  %v2674_v49 = vsel %vm137_vm8, %v2585_v29, -1e+30  ;;  %vm139_vm10 = vcmp.gt.s32.totalorder %v2683_v23, 0  ;;  %v3806_v23 = vunpack.c.0.s8 %v2443_v48 }
 0x160   :  { %3787 = vst [vmem:[#allocation27_spill] sm:$0xff] %v2592_v32  ;;  %541 = vmax.xlane.f32.xlu1 %v2573_v25  ;;  %v2696_v29 = vsel %vm137_vm8, %v2592_v32, -1e+30  ;;  %v2701_v6 = vsel %vm138_vm9, %v2589_v31, -1e+30  ;;  %vm140_vm11 = vcmp.gt.s32.totalorder %v2687_v20, 0 }
 0x161   :  { %v2607_v36 = vpop.f32.mrb[10].mxu0  ;;  %v2721_v15 = vand.u32 2, %v3711_v22  ;;  %v2725_v12 = vand.u32 2, %v3712_v27  ;;  %v3719_v22 = vunpack.c.2.s8 %v2689_v18  ;;  %v3720_v27 = vunpack.c.3.s8 %v2689_v18 }
 0x162   :  { %3788 = vst [vmem:[#allocation28_spill] sm:$0xff] %v2607_v36  ;;  %v2611_v38 = vpop.f32.mrb[11].mxu0  ;;  %v2613_v39 = vpop.f32.mrb[10].mxu1  ;;  %v2717_v31 = vsel %vm140_vm11, %v2607_v36, -1e+30 }
 0x163   :  { %3789 = vst [vmem:[#allocation29_spill] sm:$0xff] %v2611_v38  ;;  %3790 = vst [vmem:[#allocation30_spill] sm:$0xff] %v2613_v39  ;;  %1149 = vmax.xlane.f32.xlu0 %v2598_v33  ;;  %v2616_v40 = vpop.f32.mrb[11].mxu1  ;;  %v2712_v32 = vsel %vm139_vm10, %v2611_v38, -1e+30  ;;  %vm141_vm12 = vcmp.gt.s32.totalorder %v2721_v15, 0 }
 0x164   :  { %3791 = vst [vmem:[#allocation31_spill] sm:$0xff] %v2616_v40  ;;  %1151 = vmax.xlane.f32.xlu1 %v2603_v34  ;;  %v2732_v38 = vsel %vm139_vm10, %v2616_v40, -1e+30  ;;  %v2737_v36 = vsel %vm140_vm11, %v2613_v39, -1e+30  ;;  %vm142_vm13 = vcmp.gt.s32.totalorder %v2725_v12, 0  ;;  %v3807_v12 = vunpack.c.3.s8 %v2443_v48 }
 0x165   :  { %v2633_v44 = vpop.f32.mrb[12].mxu0  ;;  %v2757_v7 = vand.u32 2, %v3719_v22  ;;  %v2761_v5 = vand.u32 2, %v3720_v27 }
 0x166   :  { %3792 = vst [vmem:[#allocation32_spill] sm:$0xff] %v2633_v44  ;;  %v2639_v46 = vpop.f32.mrb[13].mxu0  ;;  %v2641_v47 = vpop.f32.mrb[12].mxu1  ;;  %v2753_v39 = vsel %vm142_vm13, %v2633_v44, -1e+30 }
 0x167   :  { %3793 = vst [vmem:[#allocation33_spill] sm:$0xff] %v2639_v46  ;;  %3794 = vst [vmem:[#allocation34_spill] sm:$0xff] %v2641_v47  ;;  %543 = vmax.xlane.f32.xlu0 %v2622_v41  ;;  %v2644_v19 = vpop.f32.mrb[13].mxu1  ;;  %v2748_v40 = vsel %vm141_vm12, %v2639_v46, -1e+30  ;;  %vm143_vm14 = vcmp.gt.s32.totalorder %v2757_v7, 0 }
 0x168   :  { %3795 = vst [vmem:[#allocation35_spill] sm:$0xff] %v2644_v19  ;;  %545 = vmax.xlane.f32.xlu1 %v2627_v42  ;;  %v2768_v46 = vsel %vm141_vm12, %v2644_v19, -1e+30  ;;  %v2773_v44 = vsel %vm142_vm13, %v2641_v47, -1e+30  ;;  %vm144_vm15 = vcmp.gt.s32.totalorder %v2761_v5, 0 }
 0x169   :  { %v2659_v2 = vpop.f32.mrb[14].mxu0 }
 0x16a   :  { %3796 = vst [vmem:[#allocation36_spill] sm:$0xff] %v2659_v2  ;;  %v2663_v52 = vpop.f32.mrb[15].mxu0  ;;  %v2665_v53 = vpop.f32.mrb[14].mxu1  ;;  %v2787_v27 = vsel %vm144_vm15, %v2659_v2, -1e+30 }
 0x16b   :  { %3797 = vst [vmem:[#allocation37_spill] sm:$0xff] %v2663_v52  ;;  %3798 = vst [vmem:[#allocation38_spill] sm:$0xff] %v2665_v53  ;;  %1153 = vmax.xlane.f32.xlu0 %v2650_v35  ;;  %v2668_v51 = vpop.f32.mrb[15].mxu1  ;;  %v2782_v22 = vsel %vm143_vm14, %v2663_v52, -1e+30  ;;  %v3728_v52 = vmov 0.0  }
 0x16c   :  { %3799 = vst [vmem:[#allocation39_spill] sm:$0xff] %v2668_v51  ;;  %1155 = vmax.xlane.f32.xlu1 %v2655_v37  ;;  %v2794_v19 = vsel %vm143_vm14, %v2668_v51, -1e+30  ;;  %v2799_v47 = vsel %vm144_vm15, %v2665_v53, -1e+30  ;;  %v1704_v2 = vsel %vm129_vm1, 1.0, %v3728_v52 }
 0x16d   :  { %v1705_v14 = vsel %vm130_vm0, 1.0, %v3728_v52  ;;  %v1706_v51 = vsel %vm131_vm2, 1.0, %v3728_v52  ;;  %v1707_v53 = vsel %vm132_vm3, 1.0, %v3728_v52  ;;  %v1708_v54 = vsel %vm133_vm4, 1.0, %v3728_v52 }
 0x16e   :  { %v1709_v50 = vsel %vm134_vm5, 1.0, %v3728_v52  ;;  %v1710_v56 = vsel %vm135_vm6, 1.0, %v3728_v52  ;;  %v1711_v60 = vsel %vm136_vm7, 1.0, %v3728_v52 }
 0x16f   :  { %547 = vmax.xlane.f32.xlu0 %v2674_v49 }
 0x170   :  { %549 = vmax.xlane.f32.xlu1 %v2679_v21 }
 0x173   :  { %1157 = vmax.xlane.f32.xlu0 %v2696_v29 }
 0x174   :  { %1159 = vmax.xlane.f32.xlu1 %v2701_v6 }
 0x177   :  { %551 = vmax.xlane.f32.xlu0 %v2712_v32 }
 0x178   :  { %553 = vmax.xlane.f32.xlu1 %v2717_v31 }
 0x17b   :  { %1161 = vmax.xlane.f32.xlu0 %v2732_v38 }
 0x17c   :  { %1163 = vmax.xlane.f32.xlu1 %v2737_v36 }
 0x17f   :  { %555 = vmax.xlane.f32.xlu0 %v2748_v40 }
 0x180   :  { %557 = vmax.xlane.f32.xlu1 %v2753_v39 }
 0x183   :  { %1165 = vmax.xlane.f32.xlu0 %v2768_v46 }
 0x184   :  { %1167 = vmax.xlane.f32.xlu1 %v2773_v44 }
 0x187   :  { %559 = vmax.xlane.f32.xlu0 %v2782_v22 }
 0x188   :  { %561 = vmax.xlane.f32.xlu1 %v2787_v27 }
 0x18b   :  { %1169 = vmax.xlane.f32.xlu0 %v2794_v19 }
 0x18c   :  { %1171 = vmax.xlane.f32.xlu1 %v2799_v47 }
 0x18f   :  { %241 = vadd.xlane.f32.xlu0 %v1704_v2 }
 0x190   :  { %243 = vadd.xlane.f32.xlu1 %v1705_v14 }
 0x193   :  { %245 = vadd.xlane.f32.xlu0 %v1706_v51 }
 0x194   :  { %247 = vadd.xlane.f32.xlu1 %v1707_v53 }
 0x197   :  { %249 = vadd.xlane.f32.xlu0 %v1708_v54 }
 0x198   :  { %251 = vadd.xlane.f32.xlu1 %v1709_v50 }
 0x19b   :  { %253 = vadd.xlane.f32.xlu0 %v1710_v56 }
 0x19c   :  { %255 = vadd.xlane.f32.xlu1 %v1711_v60 }
 0x1dc   :  { %v2827_v51 = vpop.xlane.xlu0 %533 }
 0x1dd   :  { %v2829_v53 = vpop.xlane.xlu1 %1143  ;;  %v564_v2 = vsub.f32 %v2471_v59, %v2827_v51 }
 0x1de   :  { %v1174_v11 = vsub.f32 %v2482_v62, %v2829_v53 }
 0x1df   :  { %v581_v13 = vmul.f32 1.442695, %v564_v2 }
 0x1e0   :  { %v1191_v14 = vmul.f32 1.442695, %v1174_v11  ;;  %v2835_v26 = vpop.xlane.xlu0 %531 }
 0x1e1   :  { %1972 = vpow2.f32 %v581_v13  ;;  %v2837_v54 = vpop.xlane.xlu1 %1141  ;;  %v563_v28 = vsub.f32 %v2501_v3, %v2835_v26 }
 0x1e2   :  { %v1173_v50 = vsub.f32 %v2492_v0, %v2837_v54  ;;  %1974 = vpow2.f32 %v1191_v14 }
 0x1e3   :  { %v579_v56 = vmul.f32 1.442695, %v563_v28 }
 0x1e4   :  { %v2843_v60 = vpop.xlane.xlu0 %535  ;;  %v1189_v59 = vmul.f32 1.442695, %v1173_v50 }
 0x1e5   :  { %1976 = vpow2.f32 %v579_v56  ;;  %v2845_v62 = vpop.xlane.xlu1 %537  ;;  %v565_v2 = vsub.f32 %v2516_v8, %v2843_v60 }
 0x1e6   :  { %v566_v11 = vsub.f32 %v2521_v9, %v2845_v62  ;;  %1978 = vpow2.f32 %v1189_v59 }
 0x1e7   :  { %v583_v3 = vmul.f32 1.442695, %v565_v2 }
 0x1e8   :  { %v585_v13 = vmul.f32 1.442695, %v566_v11  ;;  %v2851_v52 = vpop.xlane.xlu0 %1145 }
 0x1e9   :  { %3802 = vst [vmem:[#allocation40_spill] sm:$0xff] %v2851_v52  ;;  %v2853_v0 = vpop.xlane.xlu1 %1147  ;;  %v1175_v14 = vsub.f32 %v2544_v16, %v2851_v52 }
 0x1ea   :  { %1980 = vpow2.f32 %v585_v13  ;;  %v1176_v28 = vsub.f32 %v2549_v17, %v2853_v0 }
 0x1eb   :  { %v1973_v50 = vpop.eup %1972  ;;  %1982 = vpow2.f32 %v583_v3  ;;  %v1193_v9 = vmul.f32 1.442695, %v1175_v14 }
 0x1ec   :  { %v1195_v56 = vmul.f32 1.442695, %v1176_v28  ;;  %613 = vadd.xlane.f32.xlu1 %v1973_v50  ;;  %v2859_v8 = vpop.xlane.xlu0 %539  ;;  %v1975_v2 = vpop.eup %1974 }
 0x1ed   :  { %3803 = vst [vmem:[#allocation41_spill] sm:$0xff] %v2859_v8  ;;  %v2861_v11 = vpop.xlane.xlu1 %541  ;;  %v567_v59 = vsub.f32 %v2568_v24, %v2859_v8 }
 0x1ee   :  { %1984 = vpow2.f32 %v1195_v56  ;;  %v568_v16 = vsub.f32 %v2573_v25, %v2861_v11 }
 0x1ef   :  { %v1977_v13 = vpop.eup %1976  ;;  %1986 = vpow2.f32 %v1193_v9  ;;  %v587_v28 = vmul.f32 1.442695, %v567_v59 }
 0x1f0   :  { %v589_v52 = vmul.f32 1.442695, %v568_v16  ;;  %1223 = vadd.xlane.f32.xlu1 %v1975_v2  ;;  %v2867_v17 = vpop.xlane.xlu0 %1149  ;;  %611 = vadd.xlane.f32.xlu0 %v1977_v13  ;;  %v1979_v50 = vpop.eup %1978 }
 0x1f1   :  { %v2869_v3 = vpop.xlane.xlu1 %1151  ;;  %v1177_v14 = vsub.f32 %v2598_v33, %v2867_v17 }
 0x1f2   :  { %1988 = vpow2.f32 %v589_v52  ;;  %v1178_v24 = vsub.f32 %v2603_v34, %v2869_v3 }
 0x1f3   :  { %1990 = vpow2.f32 %v587_v28  ;;  %v1197_v2 = vmul.f32 1.442695, %v1177_v14 }
 0x1f4   :  { %v1981_v56 = vpop.eup %1980  ;;  %v1199_v25 = vmul.f32 1.442695, %v1178_v24  ;;  %v2875_v8 = vpop.xlane.xlu0 %543  ;;  %1221 = vadd.xlane.f32.xlu0 %v1979_v50 }
 0x1f5   :  { %617 = vadd.xlane.f32.xlu1 %v1981_v56  ;;  %v2877_v9 = vpop.xlane.xlu1 %545  ;;  %v569_v59 = vsub.f32 %v2622_v41, %v2875_v8  ;;  %v1983_v33 = vpop.eup %1982 }
 0x1f6   :  { %1992 = vpow2.f32 %v1199_v25  ;;  %v570_v52 = vsub.f32 %v2627_v42, %v2877_v9 }
 0x1f7   :  { %1994 = vpow2.f32 %v1197_v2  ;;  %v591_v24 = vmul.f32 1.442695, %v569_v59 }
 0x1f8   :  { %v1985_v34 = vpop.eup %1984  ;;  %v593_v16 = vmul.f32 1.442695, %v570_v52  ;;  %v2883_v13 = vpop.xlane.xlu0 %1153  ;;  %615 = vadd.xlane.f32.xlu0 %v1983_v33 }
 0x1f9   :  { %1227 = vadd.xlane.f32.xlu1 %v1985_v34  ;;  %v2885_v28 = vpop.xlane.xlu1 %1155  ;;  %v1179_v14 = vsub.f32 %v2650_v35, %v2883_v13  ;;  %v1987_v50 = vpop.eup %1986 }
 0x1fa   :  { %1996 = vpow2.f32 %v593_v16  ;;  %v1180_v41 = vsub.f32 %v2655_v37, %v2885_v28 }
 0x1fb   :  { %1998 = vpow2.f32 %v591_v24  ;;  %v1201_v52 = vmul.f32 1.442695, %v1179_v14 }
 0x1fc   :  { %v1989_v42 = vpop.eup %1988  ;;  %v1203_v56 = vmul.f32 1.442695, %v1180_v41  ;;  %v2891_v25 = vpop.xlane.xlu0 %547  ;;  %1225 = vadd.xlane.f32.xlu0 %v1987_v50 }
 0x1fd   :  { %621 = vadd.xlane.f32.xlu1 %v1989_v42  ;;  %v2893_v2 = vpop.xlane.xlu1 %549  ;;  %v571_v59 = vsub.f32 %v2674_v49, %v2891_v25  ;;  %v1991_v33 = vpop.eup %1990 }
 0x1fe   :  { %2000 = vpow2.f32 %v1203_v56  ;;  %v572_v35 = vsub.f32 %v2679_v21, %v2893_v2 }
 0x1ff   :  { %2002 = vpow2.f32 %v1201_v52  ;;  %v595_v41 = vmul.f32 1.442695, %v571_v59 }
 0x200   :  { %v1993_v37 = vpop.eup %1992  ;;  %v597_v34 = vmul.f32 1.442695, %v572_v35  ;;  %v2899_v16 = vpop.xlane.xlu0 %1157  ;;  %619 = vadd.xlane.f32.xlu0 %v1991_v33 }
 0x201   :  { %1231 = vadd.xlane.f32.xlu1 %v1993_v37  ;;  %v2901_v24 = vpop.xlane.xlu1 %1159  ;;  %v1181_v14 = vsub.f32 %v2696_v29, %v2899_v16  ;;  %v1995_v50 = vpop.eup %1994 }
 0x202   :  { %2004 = vpow2.f32 %v597_v34  ;;  %v1182_v49 = vsub.f32 %v2701_v6, %v2901_v24 }
 0x203   :  { %2006 = vpow2.f32 %v595_v41  ;;  %v1205_v35 = vmul.f32 1.442695, %v1181_v14 }
 0x204   :  { %v1997_v21 = vpop.eup %1996  ;;  %v1207_v42 = vmul.f32 1.442695, %v1182_v49  ;;  %v2907_v56 = vpop.xlane.xlu0 %551  ;;  %1229 = vadd.xlane.f32.xlu0 %v1995_v50 }
 0x205   :  { %625 = vadd.xlane.f32.xlu1 %v1997_v21  ;;  %v2909_v52 = vpop.xlane.xlu1 %553  ;;  %v573_v59 = vsub.f32 %v2712_v32, %v2907_v56  ;;  %v1999_v33 = vpop.eup %1998 }
 0x206   :  { %2008 = vpow2.f32 %v1207_v42  ;;  %v574_v29 = vsub.f32 %v2717_v31, %v2909_v52 }
 0x207   :  { %2010 = vpow2.f32 %v1205_v35  ;;  %v599_v49 = vmul.f32 1.442695, %v573_v59 }
 0x208   :  { %v2001_v6 = vpop.eup %2000  ;;  %v601_v37 = vmul.f32 1.442695, %v574_v29  ;;  %v2915_v34 = vpop.xlane.xlu0 %1161  ;;  %623 = vadd.xlane.f32.xlu0 %v1999_v33 }
 0x209   :  { %1235 = vadd.xlane.f32.xlu1 %v2001_v6  ;;  %v2917_v41 = vpop.xlane.xlu1 %1163  ;;  %v1183_v14 = vsub.f32 %v2732_v38, %v2915_v34  ;;  %v2003_v50 = vpop.eup %2002 }
 0x20a   :  { %2012 = vpow2.f32 %v601_v37  ;;  %v1184_v32 = vsub.f32 %v2737_v36, %v2917_v41 }
 0x20b   :  { %2014 = vpow2.f32 %v599_v49  ;;  %v1209_v29 = vmul.f32 1.442695, %v1183_v14 }
 0x20c   :  { %v2005_v31 = vpop.eup %2004  ;;  %v1211_v21 = vmul.f32 1.442695, %v1184_v32  ;;  %v2923_v42 = vpop.xlane.xlu0 %555  ;;  %1233 = vadd.xlane.f32.xlu0 %v2003_v50 }
 0x20d   :  { %629 = vadd.xlane.f32.xlu1 %v2005_v31  ;;  %v2925_v35 = vpop.xlane.xlu1 %557  ;;  %v575_v59 = vsub.f32 %v2748_v40, %v2923_v42  ;;  %v2007_v33 = vpop.eup %2006 }
 0x20e   :  { %2016 = vpow2.f32 %v1211_v21  ;;  %v576_v38 = vsub.f32 %v2753_v39, %v2925_v35 }
 0x20f   :  { %2018 = vpow2.f32 %v1209_v29  ;;  %v603_v32 = vmul.f32 1.442695, %v575_v59 }
 0x210   :  { %v2009_v36 = vpop.eup %2008  ;;  %v605_v6 = vmul.f32 1.442695, %v576_v38  ;;  %v2931_v37 = vpop.xlane.xlu0 %1165  ;;  %627 = vadd.xlane.f32.xlu0 %v2007_v33 }
 0x211   :  { %1239 = vadd.xlane.f32.xlu1 %v2009_v36  ;;  %v2933_v49 = vpop.xlane.xlu1 %1167  ;;  %v1185_v14 = vsub.f32 %v2768_v46, %v2931_v37  ;;  %v2011_v50 = vpop.eup %2010 }
 0x212   :  { %2020 = vpow2.f32 %v605_v6  ;;  %v1186_v40 = vsub.f32 %v2773_v44, %v2933_v49 }
 0x213   :  { %2022 = vpow2.f32 %v603_v32  ;;  %v1213_v38 = vmul.f32 1.442695, %v1185_v14 }
 0x214   :  { %v2013_v39 = vpop.eup %2012  ;;  %v1215_v31 = vmul.f32 1.442695, %v1186_v40  ;;  %v2939_v21 = vpop.xlane.xlu0 %559  ;;  %1237 = vadd.xlane.f32.xlu0 %v2011_v50 }
 0x215   :  { %633 = vadd.xlane.f32.xlu1 %v2013_v39  ;;  %v2941_v29 = vpop.xlane.xlu1 %561  ;;  %v577_v59 = vsub.f32 %v2782_v22, %v2939_v21  ;;  %v2015_v33 = vpop.eup %2014 }
 0x216   :  { %2024 = vpow2.f32 %v1215_v31  ;;  %v578_v46 = vsub.f32 %v2787_v27, %v2941_v29 }
 0x217   :  { %2026 = vpow2.f32 %v1213_v38  ;;  %v607_v40 = vmul.f32 1.442695, %v577_v59 }
 0x218   :  { %v2017_v44 = vpop.eup %2016  ;;  %v609_v36 = vmul.f32 1.442695, %v578_v46  ;;  %v2947_v6 = vpop.xlane.xlu0 %1169  ;;  %631 = vadd.xlane.f32.xlu0 %v2015_v33 }
 0x219   :  { %1243 = vadd.xlane.f32.xlu1 %v2017_v44  ;;  %v2949_v32 = vpop.xlane.xlu1 %1171  ;;  %v1187_v14 = vsub.f32 %v2794_v19, %v2947_v6  ;;  %v2019_v50 = vpop.eup %2018 }
 0x21a   :  { %2028 = vpow2.f32 %v609_v36  ;;  %v1188_v22 = vsub.f32 %v2799_v47, %v2949_v32  ;;  %v3804_v47 = vmov 0.0  }
 0x21b   :  { %2030 = vpow2.f32 %v607_v40  ;;  %v1217_v31 = vmul.f32 1.442695, %v1187_v14  ;;  %v1713_v36 = vsel %vm138_vm9, 1.0, %v3804_v47  ;;  %v1712_v14 = vsel %vm137_vm8, 1.0, %v3804_v47 }
 0x21c   :  { %v2021_v27 = vpop.eup %2020  ;;  %v1219_v39 = vmul.f32 1.442695, %v1188_v22  ;;  %1241 = vadd.xlane.f32.xlu0 %v2019_v50  ;;  %v1715_v22 = vsel %vm140_vm11, 1.0, %v3804_v47  ;;  %v1714_v50 = vsel %vm139_vm10, 1.0, %v3804_v47  ;;  %v1717_v45 = vsel %vm142_vm13, 1.0, %v3804_v47 }
 0x21d   :  { %637 = vadd.xlane.f32.xlu1 %v2021_v27  ;;  %v2023_v38 = vpop.eup %2022  ;;  %v3805_v27 = vunpack.c.1.s8 %v2443_v48  ;;  %v1716_v20 = vsel %vm141_vm12, 1.0, %v3804_v47  ;;  %v1719_v43 = vsel %vm144_vm15, 1.0, %v3804_v47  ;;  %v1718_v15 = vsel %vm143_vm14, 1.0, %v3804_v47 }
 0x21e   :  { %2032 = vpow2.f32 %v1219_v39 }
 0x21f   :  { %2034 = vpow2.f32 %v1217_v31  ;;  %v2972_v39 = vand.u32 1, %v3805_v27  ;;  %v2982_v31 = vand.u32 1, %v3806_v23 }
 0x220   :  { %v2025_v59 = vpop.eup %2024  ;;  %635 = vadd.xlane.f32.xlu0 %v2023_v38  ;;  %v2987_v38 = vand.u32 1, %v3807_v12 }
 0x221   :  { %1247 = vadd.xlane.f32.xlu1 %v2025_v59  ;;  %v2027_v46 = vpop.eup %2026  ;;  %vm98_vm0 = vcmp.gt.s32.totalorder %v2972_v39, 0  ;;  %vm97_vm1 = vcmp.gt.s32.totalorder %v2982_v31, 0  ;;  %v3809_v59 = vunpack.c.2.s8 %v2443_v48  ;;  %v3812_v48 = vunpack.c.0.s8 %v2477_v61 }
 0x222   :  { %3808 = vst [vmem:[#allocation42_spill] sm:$0xff] %v2987_v38  ;;  %v1689_v5 = vsel %vm98_vm0, 1.0, %v3804_v47  ;;  %vm100_vm2 = vcmp.gt.s32.totalorder %v2987_v38, 0  ;;  %v1688_v7 = vsel %vm97_vm1, 1.0, %v3804_v47 }
 0x224   :  { %v2029_v33 = vpop.eup %2028  ;;  %1245 = vadd.xlane.f32.xlu0 %v2027_v46  ;;  %v2998_v46 = vand.u32 1, %v3809_v59 }
 0x225   :  { %641 = vadd.xlane.f32.xlu1 %v2029_v33  ;;  %v2031_v19 = vpop.eup %2030  ;;  %v3810_v33 = vunpack.c.1.s8 %v2477_v61 }
 0x226   :  { %vm99_vm3 = vcmp.gt.s32.totalorder %v2998_v46, 0 }
 0x228   :  { %v2033_v44 = vpop.eup %2032  ;;  %639 = vadd.xlane.f32.xlu0 %v2031_v19  ;;  %v3003_v19 = vand.u32 1, %v3810_v33 }
 0x229   :  { %1251 = vadd.xlane.f32.xlu1 %v2033_v44  ;;  %v2035_v40 = vpop.eup %2034  ;;  %v1691_v44 = vsel %vm100_vm2, 1.0, %v3804_v47 }
 0x22a   :  { %3811 = vst [vmem:[#allocation43_spill] sm:$0xff] %v3003_v19  ;;  %vm102_vm4 = vcmp.gt.s32.totalorder %v3003_v19, 0 }
 0x22c   :  { %1249 = vadd.xlane.f32.xlu0 %v2035_v40  ;;  %v3814_v40 = vunpack.c.3.s8 %v2477_v61 }
 0x22d   :  { %259 = vadd.xlane.f32.xlu1 %v1713_v36  ;;  %v3014_v36 = vand.u32 1, %v3812_v48 }
 0x22f   :  { %3813 = vst [vmem:[#allocation44_spill] sm:$0xff] %v3014_v36  ;;  %vm101_vm5 = vcmp.gt.s32.totalorder %v3014_v36, 0 }
 0x230   :  { %257 = vadd.xlane.f32.xlu0 %v1712_v14  ;;  %v3019_v14 = vand.u32 1, %v3814_v40  ;;  %v1692_v23 = vsel %vm101_vm5, 1.0, %v3804_v47  ;;  %v3826_v40 = vunpack.c.1.s8 %v2689_v18 }
 0x231   :  { %263 = vadd.xlane.f32.xlu1 %v1715_v22  ;;  %v1690_v22 = vsel %vm99_vm3, 1.0, %v3804_v47 }
 0x232   :  { %3815 = vst [vmem:[#allocation45_spill] sm:$0xff] %v3019_v14  ;;  %vm104_vm6 = vcmp.gt.s32.totalorder %v3019_v14, 0 }
 0x233   :  { %v1695_v12 = vsel %vm104_vm6, 1.0, %v3804_v47 }
 0x234   :  { %261 = vadd.xlane.f32.xlu0 %v1714_v50  ;;  %v1693_v50 = vsel %vm102_vm4, 1.0, %v3804_v47 }
 0x235   :  { %267 = vadd.xlane.f32.xlu1 %v1717_v45  ;;  %v3816_v45 = vunpack.c.2.s8 %v2477_v61  ;;  %v3820_v61 = vunpack.c.0.s8 %v2587_v30 }
 0x237   :  { %v3030_v27 = vand.u32 1, %v3816_v45 }
 0x238   :  { %265 = vadd.xlane.f32.xlu0 %v1716_v20  ;;  %v3818_v20 = vunpack.c.1.s8 %v2587_v30 }
 0x239   :  { %271 = vadd.xlane.f32.xlu1 %v1719_v43  ;;  %3817 = vst [vmem:[#allocation46_spill] sm:$0xff] %v3030_v27  ;;  %vm103_vm7 = vcmp.gt.s32.totalorder %v3030_v27, 0 }
 0x23a   :  { %v3035_v43 = vand.u32 1, %v3818_v20  ;;  %v1694_v33 = vsel %vm103_vm7, 1.0, %v3804_v47 }
 0x23c   :  { %269 = vadd.xlane.f32.xlu0 %v1718_v15  ;;  %3819 = vst [vmem:[#allocation47_spill] sm:$0xff] %v3035_v43  ;;  %v3046_v15 = vand.u32 1, %v3820_v61  ;;  %vm106_vm8 = vcmp.gt.s32.totalorder %v3035_v43, 0 }
 0x23d   :  { %179 = vadd.xlane.f32.xlu1 %v1689_v5  ;;  %v3822_v5 = vunpack.c.3.s8 %v2587_v30 }
 0x23e   :  { %3821 = vst [vmem:[#allocation48_spill] sm:$0xff] %v3046_v15  ;;  %vm105_vm9 = vcmp.gt.s32.totalorder %v3046_v15, 0 }
 0x23f   :  { %v3051_v59 = vand.u32 1, %v3822_v5 }
 0x240   :  { %177 = vadd.xlane.f32.xlu0 %v1688_v7  ;;  %v1697_v7 = vsel %vm106_vm8, 1.0, %v3804_v47 }
 0x241   :  { %183 = vadd.xlane.f32.xlu1 %v1691_v44  ;;  %3823 = vst [vmem:[#allocation49_spill] sm:$0xff] %v3051_v59  ;;  %v3824_v44 = vunpack.c.2.s8 %v2587_v30  ;;  %vm108_vm10 = vcmp.gt.s32.totalorder %v3051_v59, 0  ;;  %v3828_v30 = vunpack.c.0.s8 %v2689_v18 }
 0x242   :  { %v1699_v45 = vsel %vm108_vm10, 1.0, %v3804_v47 }
 0x243   :  { %v3062_v48 = vand.u32 1, %v3824_v44  ;;  %v3078_v20 = vand.u32 1, %v3828_v30 }
 0x244   :  { %181 = vadd.xlane.f32.xlu0 %v1690_v22  ;;  %v3067_v22 = vand.u32 1, %v3826_v40 }
 0x245   :  { %187 = vadd.xlane.f32.xlu1 %v1693_v50  ;;  %3825 = vst [vmem:[#allocation50_spill] sm:$0xff] %v3062_v48  ;;  %v1696_v50 = vsel %vm105_vm9, 1.0, %v3804_v47  ;;  %vm107_vm11 = vcmp.gt.s32.totalorder %v3062_v48, 0  ;;  %3829 = vst [vmem:[#allocation52_spill] sm:$0xff] %v3078_v20  ;;  %vm109_vm13 = vcmp.gt.s32.totalorder %v3078_v20, 0 }
 0x246   :  { %3827 = vst [vmem:[#allocation51_spill] sm:$0xff] %v3067_v22  ;;  %vm3758_vm12 = vcmp.gt.s32.totalorder %v3067_v22, 0  ;;  %v1698_v61 = vsel %vm107_vm11, 1.0, %v3804_v47  ;;  %v1700_v44 = vsel %vm109_vm13, 1.0, %v3804_v47 }
 0x247   :  { %v1701_v5 = vsel %vm3758_vm12, 1.0, %v3804_v47 }
 0x248   :  { %185 = vadd.xlane.f32.xlu0 %v1692_v23  ;;  %v3830_v23 = vunpack.c.3.s8 %v2689_v18 }
 0x249   :  { %191 = vadd.xlane.f32.xlu1 %v1695_v12 }
 0x24a   :  { %v3083_v12 = vand.u32 1, %v3830_v23 }
 0x24c   :  { %189 = vadd.xlane.f32.xlu0 %v1694_v33  ;;  %3831 = vst [vmem:[#allocation53_spill] sm:$0xff] %v3083_v12  ;;  %v3832_v33 = vunpack.c.2.s8 %v2689_v18  ;;  %vm3748_vm14 = vcmp.gt.s32.totalorder %v3083_v12, 0 }
 0x24d   :  { %195 = vadd.xlane.f32.xlu1 %v1697_v7  ;;  %v1703_v40 = vsel %vm3748_vm14, 1.0, %v3804_v47 }
 0x24e   :  { %v3094_v7 = vand.u32 1, %v3832_v33 }
 0x250   :  { %193 = vadd.xlane.f32.xlu0 %v1696_v50  ;;  %3833 = vst [vmem:[#allocation54_spill] sm:$0xff] %v3094_v7  ;;  %vm3753_vm15 = vcmp.gt.s32.totalorder %v3094_v7, 0  ;;  %v3107_v50 = vpop.xlane.xlu1 %243 }
 0x251   :  { %199 = vadd.xlane.f32.xlu1 %v1699_v45  ;;  %v1702_v18 = vsel %vm3753_vm15, 1.0, %v3804_v47  ;;  %3834 = vst [vmem:[#allocation55_spill] sm:$0xff] %v3107_v50  ;;  %v3109_v45 = vpop.xlane.xlu0 %241  ;;  %vm644_vm14 = vcmp.gt.f32.partialorder %v3107_v50, 0.0 }
 0x252   :  { %3835 = vst [vmem:[#allocation56_spill] sm:$0xff] %v3109_v45  ;;  %vm643_vm15 = vcmp.gt.f32.partialorder %v3109_v45, 0.0 }
 0x254   :  { %197 = vadd.xlane.f32.xlu0 %v1698_v61  ;;  %v3111_v30 = vpop.xlane.xlu1 %247 }
 0x255   :  { %203 = vadd.xlane.f32.xlu1 %v1701_v5  ;;  %3836 = vst [vmem:[#allocation57_spill] sm:$0xff] %v3111_v30  ;;  %v3113_v23 = vpop.xlane.xlu0 %245 }
 0x256   :  { %3837 = vst [vmem:[#allocation58_spill] sm:$0xff] %v3113_v23 }
 0x258   :  { %201 = vadd.xlane.f32.xlu0 %v1700_v44  ;;  %v3115_v61 = vpop.xlane.xlu1 %251 }
 0x259   :  { %207 = vadd.xlane.f32.xlu1 %v1703_v40  ;;  %3838 = vst [vmem:[#allocation59_spill] sm:$0xff] %v3115_v61  ;;  %v3117_v5 = vpop.xlane.xlu0 %249  ;;  %vm648_vm12 = vcmp.gt.f32.partialorder %v3115_v61, 0.0 }
 0x25a   :  { %3839 = vst [vmem:[#allocation60_spill] sm:$0xff] %v3117_v5 }
 0x25c   :  { %205 = vadd.xlane.f32.xlu0 %v1702_v18  ;;  %v3119_v33 = vpop.xlane.xlu1 %255 }
 0x25d   :  { %3840 = vst [vmem:[#allocation61_spill] sm:$0xff] %v3119_v33  ;;  %v3121_v44 = vpop.xlane.xlu0 %253 }
 0x279   :  { %v614_v40 = vpop.xlane.xlu1 %613 }
 0x27a   :  { %2036 = vlog2.f32 %v614_v40 }
 0x27d   :  { %v1224_v47 = vpop.xlane.xlu1 %1223  ;;  %v612_v18 = vpop.xlane.xlu0 %611 }
 0x27e   :  { %2038 = vlog2.f32 %v1224_v47 }
 0x27f   :  { %2040 = vlog2.f32 %v612_v18 }
 0x281   :  { %v1222_v12 = vpop.xlane.xlu0 %1221 }
 0x282   :  { %v618_v7 = vpop.xlane.xlu1 %617  ;;  %2042 = vlog2.f32 %v1222_v12 }
 0x283   :  { %2044 = vlog2.f32 %v618_v7 }
 0x284   :  { %v2037_v22 = vpop.eup %2036 }
 0x285   :  { %v662_v20 = vmul.f32 0.6931472, %v2037_v22  ;;  %v616_v59 = vpop.xlane.xlu0 %615 }
 0x286   :  { %v1228_v48 = vpop.xlane.xlu1 %1227  ;;  %2046 = vlog2.f32 %v616_v59 }
 0x287   :  { %v692_v43 = vadd.f32 %v662_v20, %v2827_v51  ;;  %2048 = vlog2.f32 %v1228_v48 }
 0x288   :  { %v2039_v15 = vpop.eup %2038 }
 0x289   :  { %v2041_v40 = vpop.eup %2040  ;;  %v708_v47 = vsel %vm644_vm14, %v692_v43, -1e+30  ;;  %v1256_v18 = vmul.f32 0.6931472, %v2039_v15  ;;  %v1226_v14 = vpop.xlane.xlu0 %1225 }
 0x28a   :  { %v3128_v12 = vsub.f32 %v2458_v55, %v708_v47  ;;  %v660_v7 = vmul.f32 0.6931472, %v2041_v40  ;;  %v622_v22 = vpop.xlane.xlu1 %621 }
 0x28b   :  { %v1286_v27 = vadd.f32 %v1256_v18, %v2829_v53  ;;  %2050 = vlog2.f32 %v622_v22 }
 0x28c   :  { %v2043_v59 = vpop.eup %2042  ;;  %v691_v51 = vadd.f32 %v660_v7, %v2835_v26  ;;  %2052 = vlog2.f32 %v1226_v14  ;;  %v740_v43 = vand.u32 2147483647, %v3128_v12 }
 0x28d   :  { %v2045_v20 = vpop.eup %2044  ;;  %v1254_v48 = vmul.f32 0.6931472, %v2043_v59  ;;  %v620_v19 = vpop.xlane.xlu0 %619  ;;  %v1302_v40 = vsel %vm644_vm14, %v1286_v27, -1e+30  ;;  %vm646_vm14 = vcmp.gt.f32.partialorder %v3111_v30, 0.0 }
 0x28e   :  { %v707_v15 = vsel %vm643_vm15, %v691_v51, -1e+30  ;;  %v666_v36 = vmul.f32 0.6931472, %v2045_v20  ;;  %v1232_v55 = vpop.xlane.xlu1 %1231  ;;  %v3143_v20 = vsub.f32 %v2464_v57, %v1302_v40 }
 0x28f   :  { %v1285_v53 = vadd.f32 %v1254_v48, %v2837_v54  ;;  %2054 = vlog2.f32 %v1232_v55  ;;  %v3138_v47 = vsub.f32 %v2466_v58, %v707_v15  ;;  %v756_v54 = vsub.f32 0.0, %v740_v43 }
 0x290   :  { %v2047_v26 = vpop.eup %2046  ;;  %v694_v14 = vadd.f32 %v666_v36, %v2845_v62  ;;  %2056 = vlog2.f32 %v620_v19 }
 0x291   :  { %v1301_v18 = vsel %vm643_vm15, %v1285_v53, -1e+30  ;;  %v664_v7 = vmul.f32 0.6931472, %v2047_v26  ;;  %v1230_v22 = vpop.xlane.xlu0 %1229  ;;  %v739_v59 = vand.u32 2147483647, %v3138_v47  ;;  %v2049_v51 = vpop.eup %2048 }
 0x292   :  { %v626_v27 = vpop.xlane.xlu1 %625  ;;  %2058 = vlog2.f32 %v1230_v22  ;;  %v710_v62 = vsel %vm646_vm14, %v694_v14, -1e+30  ;;  %v3150_v19 = vsub.f32 %v2485_v63, %v1301_v18  ;;  %vm645_vm15 = vcmp.gt.f32.partialorder %v3113_v23, 0.0 }
 0x293   :  { %v693_v58 = vadd.f32 %v664_v7, %v2843_v60  ;;  %v755_v48 = vsub.f32 0.0, %v739_v59  ;;  %v1260_v15 = vmul.f32 0.6931472, %v2049_v51  ;;  %v1334_v53 = vand.u32 2147483647, %v3143_v20 }
 0x294   :  { %v3157_v7 = vsub.f32 %v2494_v1, %v710_v62  ;;  %2060 = vlog2.f32 %v626_v27  ;;  %v1333_v18 = vand.u32 2147483647, %v3150_v19 }
 0x295   :  { %v2051_v36 = vpop.eup %2050  ;;  %v624_v57 = vpop.xlane.xlu0 %623  ;;  %v771_v55 = vpack.c.bf16 %v756_v54, %v755_v48  ;;  %v709_v43 = vsel %vm645_vm15, %v693_v58, -1e+30  ;;  %v1288_v59 = vadd.f32 %v1260_v15, %v2853_v0 }
 0x296   :  { %v2053_v40 = vpop.eup %2052  ;;  %v670_v60 = vmul.f32 0.6931472, %v2051_v36  ;;  %v1236_v26 = vpop.xlane.xlu1 %1235  ;;  %v3164_v58 = vsub.f32 %v2503_v4, %v709_v43  ;;  %v1350_v36 = vsub.f32 0.0, %v1334_v53  ;;  %v1349_v62 = vsub.f32 0.0, %v1333_v18  ;;  %v3842_v53 = vld [vmem:[#allocation40_spill] sm:$0xff] }
 0x297   :  { %v780_v14 = vmul.bf16 1069105081, %v771_v55  ;;  %v1258_v51 = vmul.f32 0.6931472, %v2053_v40  ;;  %v742_v0 = vand.u32 2147483647, %v3157_v7 }
 0x298   :  { %v696_v63 = vadd.f32 %v670_v60, %v2861_v11  ;;  %v1365_v4 = vpack.c.bf16 %v1350_v36, %v1349_v62  ;;  %v1304_v40 = vsel %vm646_vm14, %v1288_v59, -1e+30  ;;  %v741_v18 = vand.u32 2147483647, %v3164_v58 }
 0x299   :  { %v2055_v22 = vpop.eup %2054  ;;  %v1234_v54 = vpop.xlane.xlu0 %1233  ;;  %2062 = vpow.bf16 %v780_v14  ;;  %v1287_v43 = vadd.f32 %v1258_v51, %v3842_v53  ;;  %v758_v36 = vsub.f32 0.0, %v742_v0  ;;  %vm647_vm14 = vcmp.gt.f32.partialorder %v3117_v5, 0.0 }
 0x29a   :  { %v2057_v48 = vpop.eup %2056  ;;  %v712_v1 = vsel %vm648_vm12, %v696_v63, -1e+30  ;;  %v1264_v11 = vmul.f32 0.6931472, %v2055_v22  ;;  %v630_v27 = vpop.xlane.xlu1 %629  ;;  %2064 = vlog2.f32 %v624_v57  ;;  %v3843_v22 = vld [vmem:[#allocation41_spill] sm:$0xff]  ;;  %v757_v51 = vsub.f32 0.0, %v741_v18 }
 0x29b   :  { %v3169_v55 = vsub.f32 %v2523_v10, %v712_v1  ;;  %v668_v60 = vmul.f32 0.6931472, %v2057_v48  ;;  %v1374_v38 = vmul.bf16 1069105081, %v1365_v4  ;;  %v1303_v57 = vsel %vm645_vm15, %v1287_v43, -1e+30 }
 0x29c   :  { %v2059_v45 = vpop.eup %2058  ;;  %v1290_v15 = vadd.f32 %v1264_v11, %v2869_v3  ;;  %v3844_v3 = vld [vmem:[#allocation18_spill] sm:$0xff]  ;;  %v3846_v11 = vld [vmem:[#allocation15_spill] sm:$0xff]  ;;  %v772_v53 = vpack.c.bf16 %v758_v36, %v757_v51  ;;  %vm649_vm15 = vcmp.gt.f32.partialorder %v3121_v44, 0.0 }
 0x29d   :  { %3841 = vst [vmem:[#allocation62_spill] sm:$0xff] %v3169_v55  ;;  %v628_v63 = vpop.xlane.xlu0 %627  ;;  %v695_v48 = vadd.f32 %v668_v60, %v3843_v22  ;;  %v1262_v1 = vmul.f32 0.6931472, %v2059_v45  ;;  %v3184_v59 = vsub.f32 %v3846_v11, %v1304_v40  ;;  %2066 = vpow.bf16 %v1374_v38 }
 0x29e   :  { %v1306_v10 = vsel %vm648_vm12, %v1290_v15, -1e+30  ;;  %v1240_v50 = vpop.xlane.xlu1 %1239  ;;  %v2061_v15 = vpop.eup %2060  ;;  %2068 = vlog2.f32 %v1236_v26  ;;  %vm650_vm12 = vcmp.gt.f32.partialorder %v3119_v33, 0.0 }
 0x29f   :  { %v3181_v14 = vsub.f32 %v3844_v3, %v1306_v10  ;;  %3847 = vst [vmem:[#allocation41_spill] sm:$0xff] %v3184_v59  ;;  %v711_v60 = vsel %vm647_vm14, %v695_v48, -1e+30  ;;  %v1289_v45 = vadd.f32 %v1262_v1, %v2867_v17  ;;  %v1336_v0 = vand.u32 2147483647, %v3184_v59  ;;  %v3848_v10 = vld [vmem:[#allocation16_spill] sm:$0xff] }
 0x2a0   :  { %v3192_v40 = vsub.f32 %v3848_v10, %v1303_v57  ;;  %v674_v18 = vmul.f32 0.6931472, %v2061_v15  ;;  %v3850_v3 = vld [vmem:[#allocation17_spill] sm:$0xff]  ;;  %v783_v17 = vmul.bf16 1069105081, %v772_v53  ;;  %2070 = vlog2.f32 %v1234_v54  ;;  %v3852_v15 = vld [vmem:[#allocation19_spill] sm:$0xff] }
 0x2a1   :  { %3845 = vst [vmem:[#allocation40_spill] sm:$0xff] %v3181_v14  ;;  %v1238_v62 = vpop.xlane.xlu0 %1237  ;;  %v3195_v11 = vsub.f32 %v3850_v3, %v711_v60  ;;  %v1305_v43 = vsel %vm647_vm14, %v1289_v45, -1e+30  ;;  %v3198_v1 = vsub.f32 0.0, %v1336_v0  ;;  %2072 = vlog2.f32 %v630_v27 }
 0x2a2   :  { %v634_v4 = vpop.xlane.xlu1 %633  ;;  %3849 = vst [vmem:[#allocation18_spill] sm:$0xff] %v3192_v40  ;;  %v1335_v38 = vand.u32 2147483647, %v3192_v40  ;;  %v698_v51 = vadd.f32 %v674_v18, %v2877_v9  ;;  %v3206_v60 = vsub.f32 %v3852_v15, %v1305_v43  ;;  %2074 = vlog2.f32 %v1240_v50  ;;  %v3854_v15 = vld [vmem:[#allocation20_spill] sm:$0xff] }
 0x2a3   :  { %3851 = vst [vmem:[#allocation15_spill] sm:$0xff] %v3195_v11  ;;  %v744_v54 = vand.u32 2147483647, %v3169_v55  ;;  %2076 = vpow.bf16 %v783_v17  ;;  %v1338_v9 = vand.u32 2147483647, %v3181_v14  ;;  %v853_v53 = vsub.f32 0.0, %v3164_v58 }
 0x2a4   :  { %v2063_v48 = vpop.eup %2062  ;;  %v3200_v36 = vsub.f32 0.0, %v1335_v38  ;;  %3853 = vst [vmem:[#allocation16_spill] sm:$0xff] %v3206_v60  ;;  %v714_v18 = vsel %vm650_vm12, %v698_v51, -1e+30  ;;  %v743_v3 = vand.u32 2147483647, %v3195_v11 }
 0x2a5   :  { %v632_v22 = vpop.xlane.xlu0 %631  ;;  %v2065_v5 = vpop.eup %2064  ;;  %v803_v26 = vadd.bf16 1065369472, %v2063_v48  ;;  %v3223_v48 = vsub.f32 0.0, %v744_v54  ;;  %v3229_v51 = vsub.f32 %v3854_v15, %v714_v18  ;;  %v852_v18 = vsub.f32 0.0, %v3128_v12  ;;  %v3856_v12 = vld [vmem:[#allocation21_spill] sm:$0xff] }
 0x2a6   :  { %v1244_v61 = vpop.xlane.xlu1 %1243  ;;  %v672_v45 = vmul.f32 0.6931472, %v2065_v5  ;;  %v3225_v17 = vsub.f32 0.0, %v743_v3  ;;  %v1445_v15 = vsub.f32 0.0, %v3150_v19 }
 0x2a7   :  { %2078 = vlog2.bf16 %v803_v26  ;;  %v1337_v26 = vand.u32 2147483647, %v3206_v60  ;;  %3855 = vst [vmem:[#allocation17_spill] sm:$0xff] %v3229_v51  ;;  %v746_v30 = vand.u32 2147483647, %v3229_v51  ;;  %v868_v55 = vmax.f32 %v852_v18, 0.0 }
 0x2a8   :  { %v2067_v0 = vpop.eup %2066  ;;  %2080 = vlog2.f32 %v628_v63  ;;  %v697_v43 = vadd.f32 %v672_v45, %v2875_v8  ;;  %v3260_v59 = vmax.f32 %v1445_v15, 0.0 }
 0x2a9   :  { %v3203_v57 = vpop.xlane.xlu0 %1241  ;;  %v2069_v27 = vpop.eup %2068  ;;  %v1397_v5 = vadd.bf16 1065369472, %v2067_v0  ;;  %2082 = vlog2.f32 %v1238_v62  ;;  %v3232_v0 = vsub.f32 0.0, %v1338_v9  ;;  %v3238_v45 = vsub.f32 0.0, %v1337_v26 }
 0x2aa   :  { %v3208_v10 = vpop.xlane.xlu1 %637  ;;  %2084 = vlog2.f32 %v634_v4  ;;  %v1268_v63 = vmul.f32 0.6931472, %v2069_v27  ;;  %v2071_v4 = vpop.eup %2070  ;;  %v713_v54 = vsel %vm649_vm15, %v697_v43, -1e+30  ;;  %v851_v27 = vsub.f32 0.0, %v3138_v47 }
 0x2ab   :  { %2086 = vlog2.bf16 %v1397_v5  ;;  %v1446_v9 = vsub.f32 0.0, %v3143_v20  ;;  %v2073_v5 = vpop.eup %2072  ;;  %v1266_v23 = vmul.f32 0.6931472, %v2071_v4  ;;  %v3256_v20 = vsub.f32 %v3856_v12, %v713_v54 }
 0x2ac   :  { %v2075_v62 = vpop.eup %2074  ;;  %v1292_v43 = vadd.f32 %v1268_v63, %v2885_v28  ;;  %2088 = vlog2.f32 %v1244_v61  ;;  %v678_v19 = vmul.f32 0.6931472, %v2073_v5  ;;  %v867_v58 = vmax.f32 %v851_v27, 0.0 }
 0x2ad   :  { %v3217_v50 = vpop.xlane.xlu0 %635  ;;  %2090 = vlog2.f32 %v632_v22  ;;  %v3258_v11 = vmax.f32 %v1446_v9, 0.0  ;;  %v1272_v51 = vmul.f32 0.6931472, %v2075_v62  ;;  %v3262_v28 = vmax.f32 %v853_v53, 0.0 }
 0x2ae   :  { %v3221_v38 = vpop.xlane.xlu1 %1247  ;;  %v2077_v14 = vpop.eup %2076  ;;  %v745_v61 = vand.u32 2147483647, %v3256_v20  ;;  %v3265_v63 = vsub.f32 0.0, %v746_v30  ;;  %v3269_v4 = vsel %vm650_vm12, %v1292_v43, -1e+30  ;;  %2092 = vlog2.f32 %v3203_v57 }
 0x2af   :  { %v1291_v18 = vadd.f32 %v1266_v23, %v2883_v13  ;;  %2094 = vlog2.f32 %v3208_v10  ;;  %v804_v53 = vadd.bf16 1065369472, %v2077_v14  ;;  %v700_v30 = vadd.f32 %v678_v19, %v2893_v2 }
 0x2b0   :  { %v3276_v9 = vsub.f32 0.0, %v745_v61  ;;  %2096 = vlog2.f32 %v3221_v38 }
 0x2b1   :  { %v3234_v8 = vpop.xlane.xlu0 %1245  ;;  %2098 = vlog2.bf16 %v804_v53 }
 0x2b2   :  { %v3242_v3 = vpop.xlane.xlu1 %641  ;;  %v2079_v26 = vpop.eup %2078  ;;  %v774_v13 = vpack.c.bf16 %v3265_v63, %v3276_v9  ;;  %2100 = vlog2.f32 %v3217_v50 }
 0x2b3   :  { %v2081_v40 = vpop.eup %2080  ;;  %v813_v54 = vmul.bf16 1060192049, %v2079_v26  ;;  %v1294_v26 = vadd.f32 %v1272_v51, %v2901_v24  ;;  %v3290_v24 = vsel %vm649_vm15, %v1291_v18, -1e+30  ;;  %v3858_v18 = vpack.c.bf16 %v3198_v1, %v3200_v36 }
 0x2b4   :  { %v2083_v22 = vpop.eup %2082  ;;  %v676_v5 = vmul.f32 0.6931472, %v2081_v40  ;;  %2102 = vlog2.f32 %v3242_v3 }
 0x2b5   :  { %v3253_v47 = vpop.xlane.xlu0 %639  ;;  %v2085_v27 = vpop.eup %2084  ;;  %v835_v43 = vunpack.c.l.bf16 %v813_v54  ;;  %v836_v12 = vunpack.c.h.bf16 %v813_v54  ;;  %v1270_v57 = vmul.f32 0.6931472, %v2083_v22  ;;  %v3857_v22 = vld [vmem:[#allocation24_spill] sm:$0xff]  ;;  %v1377_v53 = vmul.bf16 1069105081, %v3858_v18 }
 0x2b6   :  { %v1252_v60 = vpop.xlane.xlu1 %1251  ;;  %v2087_v33 = vpop.eup %2086  ;;  %v682_v10 = vmul.f32 0.6931472, %v2085_v27  ;;  %2104 = vlog2.f32 %v3234_v8 }
 0x2b7   :  { %v883_v14 = vadd.f32 %v867_v58, %v835_v43  ;;  %v884_v40 = vadd.f32 %v868_v55, %v836_v12  ;;  %v1407_v61 = vmul.bf16 1060192049, %v2087_v33  ;;  %v2089_v54 = vpop.eup %2088  ;;  %v699_v58 = vadd.f32 %v676_v5, %v2891_v25  ;;  %v3859_v43 = vld [vmem:[#allocation26_spill] sm:$0xff] }
 0x2b8   :  { %v2091_v55 = vpop.eup %2090  ;;  %v1276_v5 = vmul.f32 0.6931472, %v2089_v54  ;;  %v702_v12 = vadd.f32 %v682_v10, %v2909_v52  ;;  %2106 = vlog2.f32 %v1252_v60  ;;  %v3861_v52 = vld [vmem:[#allocation27_spill] sm:$0xff] }
 0x2b9   :  { %v3274_v62 = vpop.xlane.xlu0 %1249  ;;  %v899_v51 = vsel %vm97_vm1, %v883_v14, 0.0  ;;  %v900_v38 = vsel %vm98_vm0, %v884_v40, 0.0  ;;  %v1429_v50 = vunpack.c.l.bf16 %v1407_v61  ;;  %v680_v1 = vmul.f32 0.6931472, %v2091_v55  ;;  %v3860_v40 = vld [vmem:[#allocation25_spill] sm:$0xff] }
 0x2ba   :  { %v3279_v15 = vpop.xlane.xlu1 %259  ;;  %915 = vadd.xlane.f32.xlu1 %v899_v51  ;;  %917 = vadd.xlane.f32.xlu0 %v900_v38  ;;  %2108 = vpow.bf16 %v1377_v53 }
 0x2bb   :  { %vm652_vm14 = vcmp.gt.f32.partialorder %v3279_v15, 0.0  ;;  %v1477_v54 = vadd.f32 %v3260_v59, %v1429_v50  ;;  %2110 = vlog2.f32 %v3253_v47 }
 0x2bc   :  { %v716_v23 = vsel %vm652_vm14, %v700_v30, -1e+30  ;;  %v1310_v2 = vsel %vm652_vm14, %v1294_v26, -1e+30  ;;  %v854_v30 = vsub.f32 0.0, %v3157_v7  ;;  %v1293_v26 = vadd.f32 %v1270_v57, %v2899_v16 }
 0x2bd   :  { %v3286_v19 = vpop.xlane.xlu0 %257  ;;  %v3299_v27 = vsub.f32 %v3857_v22, %v716_v23  ;;  %v3309_v25 = vsub.f32 %v3859_v43, %v1310_v2  ;;  %v2093_v23 = vpop.eup %2092  ;;  %v1430_v16 = vunpack.c.h.bf16 %v1407_v61  ;;  %v1296_v57 = vadd.f32 %v1276_v5, %v2917_v41  ;;  %v3863_v5 = vld [vmem:[#allocation28_spill] sm:$0xff] }
 0x2be   :  { %v3301_v33 = vpop.xlane.xlu1 %263  ;;  %vm651_vm12 = vcmp.gt.f32.partialorder %v3286_v19, 0.0  ;;  %v2095_v3 = vpop.eup %2094  ;;  %v1274_v60 = vmul.f32 0.6931472, %v2093_v23  ;;  %v1493_v53 = vsel %vm97_vm1, %v1477_v54, 0.0  ;;  %2112 = vlog2.f32 %v3274_v62  ;;  %v3865_v54 = vld [vmem:[#allocation30_spill] sm:$0xff] }
 0x2bf   :  { %vm654_vm15 = vcmp.gt.f32.partialorder %v3301_v33, 0.0  ;;  %v715_v36 = vsel %vm651_vm12, %v699_v58, -1e+30  ;;  %v748_v14 = vand.u32 2147483647, %v3299_v27  ;;  %v3862_v58 = vpack.c.bf16 %v3223_v48, %v3225_v17  ;;  %v2097_v22 = vpop.eup %2096  ;;  %1509 = vadd.xlane.f32.xlu1 %v1493_v53  ;;  %v3866_v53 = vld [vmem:[#allocation29_spill] sm:$0xff] }
 0x2c0   :  { %v3318_v2 = vsub.f32 %v3860_v40, %v715_v36  ;;  %v1309_v51 = vsel %vm651_vm12, %v1293_v26, -1e+30  ;;  %v1342_v8 = vand.u32 2147483647, %v3309_v25  ;;  %v718_v38 = vsel %vm654_vm15, %v702_v12, -1e+30  ;;  %v3341_v48 = vpop.eup %2098 }
 0x2c1   :  { %v3323_v10 = vsub.f32 %v3861_v52, %v1309_v51  ;;  %v786_v55 = vmul.bf16 1069105081, %v3862_v58  ;;  %v686_v18 = vmul.f32 0.6931472, %v2095_v3  ;;  %v3334_v61 = vsub.f32 0.0, %v748_v14  ;;  %v3354_v36 = vpop.xlane.xlu0 %261  ;;  %v2101_v31 = vpop.eup %2100 }
 0x2c2   :  { %v747_v59 = vand.u32 2147483647, %v3318_v2  ;;  %v1312_v41 = vsel %vm654_vm15, %v1296_v57, -1e+30  ;;  %v1478_v50 = vadd.f32 %v3258_v11, %v1430_v16  ;;  %v3343_v17 = vsub.f32 0.0, %v1342_v8  ;;  %v3352_v23 = vpop.xlane.xlu1 %267  ;;  %v2103_v51 = vpop.eup %2102 }
 0x2c3   :  { %v1341_v43 = vand.u32 2147483647, %v3323_v10  ;;  %v3346_v47 = vsub.f32 %v3863_v5, %v718_v38  ;;  %v1280_v3 = vmul.f32 0.6931472, %v2097_v22  ;;  %v3864_v14 = vpack.c.bf16 %v3232_v0, %v3238_v45  ;;  %v2105_v57 = vpop.eup %2104 }
 0x2c4   :  { %v3348_v12 = vsub.f32 0.0, %v747_v59  ;;  %v1494_v11 = vsel %vm98_vm0, %v1478_v50, 0.0  ;;  %v3363_v8 = vsub.f32 %v3865_v54, %v1312_v41  ;;  %v701_v62 = vadd.f32 %v680_v1, %v2907_v56  ;;  %v2107_v0 = vpop.eup %2106 }
 0x2c5   :  { %v3350_v26 = vsub.f32 0.0, %v1341_v43  ;;  %v1380_v40 = vmul.bf16 1069105081, %v3864_v14  ;;  %1511 = vadd.xlane.f32.xlu0 %v1494_v11  ;;  %vm656_vm0 = vcmp.gt.f32.partialorder %v3352_v23, 0.0  ;;  %vm653_vm1 = vcmp.gt.f32.partialorder %v3354_v36, 0.0  ;;  %v3396_v54 = vpop.xlane.xlu0 %265 }
 0x2c6   :  { %v775_v52 = vpack.c.bf16 %v3334_v61, %v3348_v12  ;;  %v816_v39 = vmul.bf16 1060192049, %v3341_v48  ;;  %2114 = vpow.bf16 %v786_v55  ;;  %v684_v45 = vmul.f32 0.6931472, %v2101_v31  ;;  %v3383_v5 = vpop.xlane.xlu1 %271  ;;  %v2109_v31 = vpop.eup %2108 }
 0x2c7   :  { %v1369_v16 = vpack.c.bf16 %v3343_v17, %v3350_v26  ;;  %v750_v38 = vand.u32 2147483647, %v3346_v47  ;;  %v704_v58 = vadd.f32 %v686_v18, %v2925_v35  ;;  %v1295_v22 = vadd.f32 %v1274_v60, %v2915_v34  ;;  %v3867_v60 = vld [vmem:[#allocation31_spill] sm:$0xff] }
 0x2c8   :  { %v690_v59 = vmul.f32 0.6931472, %v2103_v51  ;;  %v1298_v43 = vadd.f32 %v1280_v3, %v2933_v49  ;;  %v717_v56 = vsel %vm653_vm1, %v701_v62, -1e+30  ;;  %2116 = vpow.bf16 %v1380_v40  ;;  %v2111_v3 = vpop.eup %2110  ;;  %v3868_v62 = vld [vmem:[#allocation32_spill] sm:$0xff] }
 0x2c9   :  { %v1344_v1 = vand.u32 2147483647, %v3363_v8  ;;  %v720_v41 = vsel %vm656_vm0, %v704_v58, -1e+30  ;;  %v3381_v55 = vsub.f32 %v3866_v53, %v717_v56  ;;  %v1311_v50 = vsel %vm653_vm1, %v1295_v22, -1e+30 }
 0x2ca   :  { %v1284_v35 = vmul.f32 0.6931472, %v2107_v0  ;;  %v1314_v34 = vsel %vm656_vm0, %v1298_v43, -1e+30  ;;  %v3388_v49 = vsub.f32 %v3867_v60, %v1311_v50  ;;  %v837_v18 = vunpack.c.l.bf16 %v816_v39 }
 0x2cb   :  { %v1278_v11 = vmul.f32 0.6931472, %v2105_v57  ;;  %v3392_v14 = vsub.f32 0.0, %v750_v38  ;;  %v749_v40 = vand.u32 2147483647, %v3381_v55  ;;  %v703_v51 = vadd.f32 %v684_v45, %v2923_v42  ;;  %v3869_v57 = vld [vmem:[#allocation34_spill] sm:$0xff]  ;;  %v2113_v45 = vpop.eup %2112 }
 0x2cc   :  { %v3399_v0 = vsub.f32 %v3868_v62, %v720_v41  ;;  %v1343_v58 = vand.u32 2147483647, %v3388_v49  ;;  %v885_v22 = vadd.f32 %v3262_v28, %v837_v18  ;;  %vm658_vm14 = vcmp.gt.f32.partialorder %v3383_v5, 0.0 }
 0x2cd   :  { %v3404_v43 = vsub.f32 0.0, %v1344_v1  ;;  %v3407_v38 = vsub.f32 %v3869_v57, %v1314_v34  ;;  %v3409_v56 = vsub.f32 0.0, %v749_v40  ;;  %v706_v42 = vadd.f32 %v690_v59, %v2941_v29  ;;  %v3870_v40 = vld [vmem:[#allocation33_spill] sm:$0xff] }
 0x2ce   :  { %v3412_v53 = vsub.f32 0.0, %v1343_v58  ;;  %v901_v41 = vsel %vm99_vm3, %v885_v22, 0.0  ;;  %v1300_v50 = vadd.f32 %v1284_v35, %v2949_v32  ;;  %vm655_vm12 = vcmp.gt.f32.partialorder %v3396_v54, 0.0  ;;  %v3871_v22 = vld [vmem:[#allocation22_spill] sm:$0xff] }
 0x2cf   :  { %v776_v28 = vpack.c.bf16 %v3392_v14, %v3409_v56  ;;  %919 = vadd.xlane.f32.xlu0 %v901_v41  ;;  %v722_v1 = vsel %vm658_vm14, %v706_v42, -1e+30  ;;  %v1297_v34 = vadd.f32 %v1278_v11, %v2931_v37  ;;  %v719_v29 = vsel %vm655_vm12, %v703_v51, -1e+30  ;;  %v3872_v37 = vld [vmem:[#allocation36_spill] sm:$0xff]  ;;  %v3873_v56 = vld [vmem:[#allocation35_spill] sm:$0xff] }
 0x2d0   :  { %v688_v59 = vmul.f32 0.6931472, %v2111_v3  ;;  %v752_v60 = vand.u32 2147483647, %v3399_v0  ;;  %v1370_v18 = vpack.c.bf16 %v3404_v43, %v3412_v53  ;;  %v3427_v32 = vsub.f32 %v3870_v40, %v719_v29  ;;  %v3443_v53 = vpop.xlane.xlu0 %269  ;;  %v3875_v29 = vld [vmem:[#allocation23_spill] sm:$0xff] }
 0x2d1   :  { %v2115_v35 = vpop.eup %2114  ;;  %v1282_v62 = vmul.f32 0.6931472, %v2113_v45  ;;  %v1316_v14 = vsel %vm658_vm14, %v1300_v50, -1e+30  ;;  %v1313_v58 = vsel %vm655_vm12, %v1297_v34, -1e+30  ;;  %v3433_v57 = vsub.f32 %v3871_v22, %v3269_v4 }
 0x2d2   :  { %v3436_v3 = vsub.f32 %v3872_v37, %v722_v1  ;;  %v751_v11 = vand.u32 2147483647, %v3427_v32  ;;  %v1346_v43 = vand.u32 2147483647, %v3407_v38  ;;  %v3441_v42 = vsub.f32 %v3873_v56, %v1313_v58  ;;  %v3874_v4 = vld [vmem:[#allocation38_spill] sm:$0xff] }
 0x2d3   :  { %v2117_v51 = vpop.eup %2116  ;;  %v1398_v45 = vadd.bf16 1065369472, %v2109_v31  ;;  %v870_v41 = vmax.f32 %v854_v30, 0.0  ;;  %v768_v50 = vsub.f32 0.0, %v752_v60  ;;  %v3448_v34 = vsub.f32 %v3874_v4, %v1316_v14  ;;  %v3876_v4 = vld [vmem:[#allocation37_spill] sm:$0xff] }
 0x2d4   :  { %v767_v1 = vsub.f32 0.0, %v751_v11  ;;  %v3452_v40 = vsub.f32 %v3875_v29, %v3290_v24  ;;  %v1345_v22 = vand.u32 2147483647, %v3441_v42  ;;  %v705_v58 = vadd.f32 %v688_v59, %v2939_v21  ;;  %v3877_v21 = vld [vmem:[#allocation39_spill] sm:$0xff] }
 0x2d5   :  { %2118 = vlog2.bf16 %v1398_v45  ;;  %v1299_v31 = vadd.f32 %v1282_v62, %v2947_v6  ;;  %v754_v37 = vand.u32 2147483647, %v3436_v3  ;;  %vm657_vm15 = vcmp.gt.f32.partialorder %v3443_v53, 0.0 }
 0x2d6   :  { %v777_v7 = vpack.c.bf16 %v768_v50, %v767_v1  ;;  %v838_v30 = vunpack.c.h.bf16 %v816_v39  ;;  %v1362_v60 = vsub.f32 0.0, %v1346_v43  ;;  %v1361_v14 = vsub.f32 0.0, %v1345_v22 }
 0x2d7   :  { %v721_v11 = vsel %vm657_vm15, %v705_v58, -1e+30  ;;  %v1315_v24 = vsel %vm657_vm15, %v1299_v31, -1e+30  ;;  %v1348_v56 = vand.u32 2147483647, %v3448_v34 }
 0x2d8   :  { %v3463_v45 = vsub.f32 %v3876_v4, %v721_v11  ;;  %v3466_v59 = vsub.f32 %v3877_v21, %v1315_v24  ;;  %v3468_v6 = vadd.f32 %v870_v41, %v838_v30  ;;  %v1371_v62 = vpack.c.bf16 %v1362_v60, %v1361_v14  ;;  %v3878_v30 = vld [vmem:[#allocation41_spill] sm:$0xff] }
 0x2d9   :  { %v805_v50 = vadd.bf16 1065369472, %v2115_v35  ;;  %v1399_v39 = vadd.bf16 1065369472, %v2117_v51  ;;  %v1340_v43 = vand.u32 2147483647, %v3433_v57 }
 0x2da   :  { %v753_v1 = vand.u32 2147483647, %v3463_v45  ;;  %v1347_v48 = vand.u32 2147483647, %v3466_v59  ;;  %v1339_v29 = vand.u32 2147483647, %v3452_v40 }
 0x2db   :  { %2120 = vlog2.bf16 %v805_v50  ;;  %v770_v22 = vsub.f32 0.0, %v754_v37  ;;  %v1364_v58 = vsub.f32 0.0, %v1348_v56  ;;  %v792_v41 = vmul.bf16 1069105081, %v775_v52  ;;  %v3879_v56 = vld [vmem:[#allocation18_spill] sm:$0xff] }
 0x2dc   :  { %v769_v31 = vsub.f32 0.0, %v753_v1  ;;  %v1363_v11 = vsub.f32 0.0, %v1347_v48  ;;  %v1448_v35 = vsub.f32 0.0, %v3878_v30  ;;  %v789_v60 = vmul.bf16 1069105081, %v774_v13 }
 0x2dd   :  { %v1386_v51 = vmul.bf16 1069105081, %v1369_v16  ;;  %2122 = vlog2.bf16 %v1399_v39  ;;  %v795_v37 = vmul.bf16 1069105081, %v776_v28  ;;  %v1447_v4 = vsub.f32 0.0, %v3879_v56  ;;  %v3880_v28 = vld [vmem:[#allocation15_spill] sm:$0xff] }
 0x2de   :  { %v778_v14 = vpack.c.bf16 %v770_v22, %v769_v31  ;;  %v1372_v24 = vpack.c.bf16 %v1364_v58, %v1363_v11  ;;  %2124 = vpow.bf16 %v789_v60  ;;  %v1356_v61 = vsub.f32 0.0, %v1340_v43 }
 0x2df   :  { %v1389_v12 = vmul.bf16 1069105081, %v1370_v18  ;;  %v1355_v52 = vsub.f32 0.0, %v1339_v29  ;;  %2126 = vpow.bf16 %v792_v41  ;;  %v1392_v50 = vmul.bf16 1069105081, %v1371_v62  ;;  %v3881_v18 = vld [vmem:[#allocation62_spill] sm:$0xff] }
 0x2e0   :  { %v2119_v21 = vpop.eup %2118  ;;  %2128 = vpow.bf16 %v1386_v51  ;;  %v1464_v63 = vmax.f32 %v1448_v35, 0.0  ;;  %v1463_v17 = vmax.f32 %v1447_v4, 0.0  ;;  %v798_v16 = vmul.bf16 1069105081, %v777_v7  ;;  %v3882_v62 = vld [vmem:[#allocation16_spill] sm:$0xff] }
 0x2e1   :  { %v1410_v1 = vmul.bf16 1060192049, %v2119_v21  ;;  %v1368_v9 = vpack.c.bf16 %v1356_v61, %v1355_v52  ;;  %2130 = vpow.bf16 %v795_v37  ;;  %v855_v48 = vsub.f32 0.0, %v3880_v28  ;;  %v3884_v51 = vld [vmem:[#allocation40_spill] sm:$0xff] }
 0x2e2   :  { %2132 = vpow.bf16 %v1389_v12  ;;  %v856_v29 = vsub.f32 0.0, %v3881_v18  ;;  %v1449_v31 = vsub.f32 0.0, %v3882_v62  ;;  %v1395_v35 = vmul.bf16 1069105081, %v1372_v24 }
 0x2e3   :  { %v1431_v13 = vunpack.c.l.bf16 %v1410_v1  ;;  %v1432_v26 = vunpack.c.h.bf16 %v1410_v1  ;;  %v1383_v39 = vmul.bf16 1069105081, %v1368_v9  ;;  %2134 = vpow.bf16 %v1392_v50 }
 0x2e4   :  { %v801_v60 = vmul.bf16 1069105081, %v778_v14  ;;  %v1450_v37 = vsub.f32 0.0, %v3884_v51  ;;  %v871_v21 = vmax.f32 %v855_v48, 0.0  ;;  %v872_v12 = vmax.f32 %v856_v29, 0.0 }
 0x2e5   :  { %v1479_v22 = vadd.f32 %v1463_v17, %v1431_v13  ;;  %v1480_v43 = vadd.f32 %v1464_v63, %v1432_v26  ;;  %2136 = vpow.bf16 %v1383_v39  ;;  %v902_v46 = vsel %vm100_vm2, %v3468_v6, 0.0 }
 0x2e6   :  { %v2121_v58 = vpop.eup %2120  ;;  %2138 = vpow.bf16 %v798_v16  ;;  %v1465_v1 = vmax.f32 %v1449_v31, 0.0  ;;  %v1466_v26 = vmax.f32 %v1450_v37, 0.0  ;;  %v857_v41 = vsub.f32 0.0, %v3256_v20 }
 0x2e7   :  { %v1495_v11 = vsel %vm99_vm3, %v1479_v22, 0.0  ;;  %v1496_v30 = vsel %vm100_vm2, %v1480_v43, 0.0  ;;  %v819_v7 = vmul.bf16 1060192049, %v2121_v58  ;;  %2140 = vpow.bf16 %v1395_v35 }
 0x2e8   :  { %1513 = vadd.xlane.f32.xlu1 %v1495_v11  ;;  %1515 = vadd.xlane.f32.xlu0 %v1496_v30  ;;  %v2123_v56 = vpop.eup %2122  ;;  %2142 = vpow.bf16 %v801_v60  ;;  %v1452_v28 = vsub.f32 0.0, %v3433_v57  ;;  %v1459_v57 = vsub.f32 0.0, %v3466_v59 }
 0x2e9   :  { %v839_v4 = vunpack.c.l.bf16 %v819_v7  ;;  %v840_v61 = vunpack.c.h.bf16 %v819_v7  ;;  %v2125_v52 = vpop.eup %2124  ;;  %v1413_v50 = vmul.bf16 1060192049, %v2123_v56  ;;  %v873_v56 = vmax.f32 %v857_v41, 0.0 }
 0x2ea   :  { %v806_v9 = vadd.bf16 1065369472, %v2125_v52  ;;  %v2127_v13 = vpop.eup %2126  ;;  %v1468_v41 = vmax.f32 %v1452_v28, 0.0 }
 0x2eb   :  { %v887_v24 = vadd.f32 %v871_v21, %v839_v4  ;;  %v888_v63 = vadd.f32 %v872_v12, %v840_v61  ;;  %v1433_v14 = vunpack.c.l.bf16 %v1413_v50  ;;  %v1434_v17 = vunpack.c.h.bf16 %v1413_v50  ;;  %v2129_v16 = vpop.eup %2128 }
 0x2ec   :  { %921 = vadd.xlane.f32.xlu1 %v902_v46  ;;  %2144 = vlog2.bf16 %v806_v9  ;;  %v2131_v39 = vpop.eup %2130  ;;  %v1401_v31 = vadd.bf16 1065369472, %v2129_v16  ;;  %v807_v35 = vadd.bf16 1065369472, %v2127_v13  ;;  %v860_v61 = vsub.f32 0.0, %v3299_v27 }
 0x2ed   :  { %v903_v48 = vsel %vm101_vm5, %v887_v24, 0.0  ;;  %v1481_v6 = vadd.f32 %v1465_v1, %v1433_v14  ;;  %v1482_v22 = vadd.f32 %v1466_v26, %v1434_v17  ;;  %v2133_v43 = vpop.eup %2132  ;;  %v904_v51 = vsel %vm102_vm4, %v888_v63, 0.0  ;;  %v3887_v1 = vld [vmem:[#allocation17_spill] sm:$0xff] }
 0x2ee   :  { %923 = vadd.xlane.f32.xlu0 %v903_v48  ;;  %v2135_v18 = vpop.eup %2134  ;;  %2146 = vlog2.bf16 %v1401_v31  ;;  %v1402_v60 = vadd.bf16 1065369472, %v2133_v43  ;;  %v808_v37 = vadd.bf16 1065369472, %v2131_v39  ;;  %v1454_v12 = vsub.f32 0.0, %v3309_v25 }
 0x2ef   :  { %v1497_v29 = vsel %vm101_vm5, %v1481_v6, 0.0  ;;  %v1498_v62 = vsel %vm102_vm4, %v1482_v22, 0.0  ;;  %v1403_v4 = vadd.bf16 1065369472, %v2135_v18  ;;  %v862_v46 = vsub.f32 0.0, %v3346_v47 }
 0x2f0   :  { %v2137_v11 = vpop.eup %2136  ;;  %1517 = vadd.xlane.f32.xlu1 %v1497_v29  ;;  %v1456_v50 = vsub.f32 0.0, %v3363_v8  ;;  %v858_v24 = vsub.f32 0.0, %v3887_v1  ;;  %v859_v9 = vsub.f32 0.0, %v3318_v2  ;;  %v1453_v13 = vsub.f32 0.0, %v3323_v10 }
 0x2f1   :  { %v1400_v30 = vadd.bf16 1065369472, %v2137_v11  ;;  %v2139_v7 = vpop.eup %2138  ;;  %v864_v14 = vsub.f32 0.0, %v3399_v0  ;;  %v1458_v27 = vsub.f32 0.0, %v3407_v38  ;;  %v861_v47 = vsub.f32 0.0, %v3381_v55 }
 0x2f2   :  { %1519 = vadd.xlane.f32.xlu0 %v1498_v62  ;;  %v2141_v21 = vpop.eup %2140  ;;  %v809_v20 = vadd.bf16 1065369472, %v2139_v7  ;;  %v1451_v8 = vsub.f32 0.0, %v3452_v40  ;;  %v874_v48 = vmax.f32 %v858_v24, 0.0  ;;  %v1455_v10 = vsub.f32 0.0, %v3388_v49 }
 0x2f3   :  { %2148 = vlog2.bf16 %v1400_v30  ;;  %v2143_v52 = vpop.eup %2142  ;;  %v1404_v17 = vadd.bf16 1065369472, %v2141_v21  ;;  %v866_v39 = vsub.f32 0.0, %v3436_v3  ;;  %v1460_v6 = vsub.f32 0.0, %v3448_v34  ;;  %v180_v3 = vpop.xlane.xlu1 %179 }
 0x2f4   :  { %925 = vadd.xlane.f32.xlu1 %v904_v51  ;;  %2150 = vlog2.bf16 %v807_v35  ;;  %v810_v26 = vadd.bf16 1065369472, %v2143_v52  ;;  %v863_v22 = vsub.f32 0.0, %v3427_v32  ;;  %v1457_v55 = vsub.f32 0.0, %v3441_v42 }
 0x2f5   :  { %2152 = vlog2.bf16 %v1402_v60  ;;  %v865_v29 = vsub.f32 0.0, %v3463_v45  ;;  %v1467_v11 = vmax.f32 %v1451_v8, 0.0  ;;  %v1469_v30 = vmax.f32 %v1453_v13, 0.0 }
 0x2f6   :  { %2154 = vlog2.bf16 %v808_v37  ;;  %v875_v42 = vmax.f32 %v859_v9, 0.0  ;;  %v1470_v51 = vmax.f32 %v1454_v12, 0.0  ;;  %v876_v37 = vmax.f32 %v860_v61, 0.0 }
 0x2f7   :  { %v2145_v63 = vpop.eup %2144  ;;  %2156 = vlog2.bf16 %v1403_v4  ;;  %v877_v4 = vmax.f32 %v861_v47, 0.0  ;;  %v1472_v13 = vmax.f32 %v1456_v50, 0.0  ;;  %v878_v8 = vmax.f32 %v862_v46, 0.0 }
 0x2f8   :  { %v822_v25 = vmul.bf16 1060192049, %v2145_v63  ;;  %2158 = vlog2.bf16 %v809_v20  ;;  %v1475_v38 = vmax.f32 %v1459_v57, 0.0 }
 0x2f9   :  { %v2147_v43 = vpop.eup %2146  ;;  %2160 = vlog2.bf16 %v1404_v17 }
 0x2fa   :  { %v841_v16 = vunpack.c.l.bf16 %v822_v25  ;;  %v842_v2 = vunpack.c.h.bf16 %v822_v25  ;;  %v1419_v58 = vmul.bf16 1060192049, %v2147_v43  ;;  %2162 = vlog2.bf16 %v810_v26 }
 0x2fc   :  { %v889_v18 = vadd.f32 %v873_v56, %v841_v16  ;;  %v890_v40 = vadd.f32 %v874_v48, %v842_v2  ;;  %v1437_v35 = vunpack.c.l.bf16 %v1419_v58  ;;  %v1438_v7 = vunpack.c.h.bf16 %v1419_v58 }
 0x2fd   :  { %v1471_v56 = vmax.f32 %v1455_v10, 0.0  ;;  %v1473_v2 = vmax.f32 %v1457_v55, 0.0  ;;  %v879_v10 = vmax.f32 %v863_v22, 0.0 }
 0x2fe   :  { %v2149_v62 = vpop.eup %2148  ;;  %v905_v31 = vsel %vm103_vm7, %v889_v18, 0.0  ;;  %v1485_v1 = vadd.f32 %v1469_v30, %v1437_v35  ;;  %v3526_v25 = vadd.f32 %v1470_v51, %v1438_v7 }
 0x2ff   :  { %927 = vadd.xlane.f32.xlu0 %v905_v31  ;;  %v1416_v32 = vmul.bf16 1060192049, %v2149_v62  ;;  %v2151_v60 = vpop.eup %2150 }
 0x300   :  { %v2153_v21 = vpop.eup %2152  ;;  %v825_v24 = vmul.bf16 1060192049, %v2151_v60  ;;  %v1502_v34 = vsel %vm106_vm8, %v3526_v25, 0.0 }
 0x301   :  { %v1435_v20 = vunpack.c.l.bf16 %v1416_v32  ;;  %v1436_v52 = vunpack.c.h.bf16 %v1416_v32  ;;  %v2155_v63 = vpop.eup %2154  ;;  %v1422_v17 = vmul.bf16 1060192049, %v2153_v21  ;;  %v880_v21 = vmax.f32 %v864_v14, 0.0 }
 0x302   :  { %v2157_v26 = vpop.eup %2156  ;;  %v843_v28 = vunpack.c.l.bf16 %v825_v24  ;;  %v844_v61 = vunpack.c.h.bf16 %v825_v24  ;;  %v828_v47 = vmul.bf16 1060192049, %v2155_v63  ;;  %v1501_v24 = vsel %vm105_vm9, %v1485_v1, 0.0 }
 0x303   :  { %v1483_v16 = vadd.f32 %v1467_v11, %v1435_v20  ;;  %v1484_v9 = vadd.f32 %v1468_v41, %v1436_v52  ;;  %v2159_v12 = vpop.eup %2158  ;;  %v1439_v48 = vunpack.c.l.bf16 %v1422_v17  ;;  %v1440_v31 = vunpack.c.h.bf16 %v1422_v17 }
 0x304   :  { %v891_v62 = vadd.f32 %v875_v42, %v843_v28  ;;  %v892_v46 = vadd.f32 %v876_v37, %v844_v61  ;;  %v845_v11 = vunpack.c.l.bf16 %v828_v47  ;;  %v846_v41 = vunpack.c.h.bf16 %v828_v47  ;;  %v2161_v55 = vpop.eup %2160 }
 0x305   :  { %v1499_v43 = vsel %vm103_vm7, %v1483_v16, 0.0  ;;  %v1500_v58 = vsel %vm104_vm6, %v1484_v9, 0.0  ;;  %v1487_v50 = vadd.f32 %v1471_v56, %v1439_v48  ;;  %v1488_v35 = vadd.f32 %v1472_v13, %v1440_v31  ;;  %v2163_v49 = vpop.eup %2162 }
 0x306   :  { %1521 = vadd.xlane.f32.xlu1 %v1499_v43  ;;  %1523 = vadd.xlane.f32.xlu0 %v1500_v58  ;;  %v907_v32 = vsel %vm105_vm9, %v891_v62, 0.0  ;;  %v1425_v22 = vmul.bf16 1060192049, %v2157_v26  ;;  %v831_v7 = vmul.bf16 1060192049, %v2159_v12  ;;  %v893_v60 = vadd.f32 %v877_v4, %v845_v11  ;;  %v3895_v62 = vld [vmem:[#allocation51_spill] sm:$0xff] }
 0x307   :  { %v894_v51 = vadd.f32 %v878_v8, %v846_v41  ;;  %v1474_v42 = vmax.f32 %v1458_v27, 0.0  ;;  %v906_v37 = vsel %vm104_vm6, %v890_v40, 0.0  ;;  %v1428_v4 = vmul.bf16 1060192049, %v2161_v55  ;;  %v3898_v41 = vld [vmem:[#allocation54_spill] sm:$0xff] }
 0x308   :  { %v1441_v56 = vunpack.c.l.bf16 %v1425_v22  ;;  %v847_v20 = vunpack.c.l.bf16 %v831_v7  ;;  %v1442_v52 = vunpack.c.h.bf16 %v1425_v22  ;;  %v848_v63 = vunpack.c.h.bf16 %v831_v7  ;;  %v3901_v22 = vld [vmem:[#allocation53_spill] sm:$0xff] }
 0x309   :  { %v834_v14 = vmul.bf16 1060192049, %v2163_v49  ;;  %v1443_v8 = vunpack.c.l.bf16 %v1428_v4  ;;  %v1444_v40 = vunpack.c.h.bf16 %v1428_v4  ;;  %v1476_v26 = vmax.f32 %v1460_v6, 0.0 }
 0x30a   :  { %929 = vadd.xlane.f32.xlu1 %v906_v37  ;;  %931 = vadd.xlane.f32.xlu0 %v907_v32  ;;  %v1489_v27 = vadd.f32 %v1473_v2, %v1441_v56  ;;  %v895_v17 = vadd.f32 %v879_v10, %v847_v20  ;;  %v1490_v0 = vadd.f32 %v1474_v42, %v1442_v52  ;;  %v908_v9 = vsel %vm106_vm8, %v892_v46, 0.0  ;;  %v3569_v46 = vpop.xlane.xlu1 %183  ;;  %v3904_v20 = vld [vmem:[#allocation55_spill] sm:$0xff] }
 0x30b   :  { %v896_v13 = vadd.f32 %v880_v21, %v848_v63  ;;  %v849_v1 = vunpack.c.l.bf16 %v834_v14  ;;  %v881_v28 = vmax.f32 %v865_v29, 0.0  ;;  %v1491_v59 = vadd.f32 %v1475_v38, %v1443_v8 }
 0x30c   :  { %v1492_v57 = vadd.f32 %v1476_v26, %v1444_v40  ;;  %v850_v2 = vunpack.c.h.bf16 %v834_v14  ;;  %v882_v12 = vmax.f32 %v866_v39, 0.0  ;;  %v909_v47 = vsel %vm107_vm11, %v893_v60, 0.0  ;;  %v178_v39 = vpop.xlane.xlu0 %177 }
 0x30d   :  { %v897_v61 = vadd.f32 %v881_v28, %v849_v1  ;;  %v1503_v45 = vsel %vm107_vm11, %v1487_v50, 0.0  ;;  %v910_v10 = vsel %vm108_vm10, %v894_v51, 0.0  ;;  %v1504_v43 = vsel %vm108_vm10, %v1488_v35, 0.0 }
 0x30e   :  { %1525 = vadd.xlane.f32.xlu1 %v1501_v24  ;;  %933 = vadd.xlane.f32.xlu0 %v908_v9  ;;  %v898_v48 = vadd.f32 %v882_v12, %v850_v2  ;;  %v911_v25 = vsel %vm109_vm13, %v895_v17, 0.0  ;;  %v1505_v58 = vsel %vm109_vm13, %v1489_v27, 0.0  ;;  %vm3896_vm2 = vcmp.gt.s32.totalorder %v3895_v62, 0  ;;  %v188_v30 = vpop.xlane.xlu1 %187  ;;  %v3905_v24 = vld [vmem:[#allocation56_spill] sm:$0xff] }
 0x30f   :  { %v912_v31 = vsel %vm3896_vm2, %v896_v13, 0.0  ;;  %vm3897_vm3 = vmmov %vm3896_vm2  ;;  %vm3899_vm4 = vcmp.gt.s32.totalorder %v3898_v41, 0  ;;  %vm3902_vm6 = vcmp.gt.s32.totalorder %v3901_v22, 0  ;;  %v290_v37 = vmax.f32 %v180_v3, 1.0 }
 0x310   :  { %v182_v50 = vpop.xlane.xlu0 %181  ;;  %v1506_v11 = vsel %vm3897_vm3, %v1490_v0, 0.0  ;;  %v913_v55 = vsel %vm3899_vm4, %v897_v61, 0.0  ;;  %vm3900_vm5 = vmmov %vm3899_vm4  ;;  %v914_v7 = vsel %vm3902_vm6, %v898_v48, 0.0  ;;  %v289_v56 = vmax.f32 %v178_v39, 1.0  ;;  %v3906_v61 = vld [vmem:[#allocation58_spill] sm:$0xff] }
 0x311   :  { %v1507_v35 = vsel %vm3900_vm5, %v1491_v59, 0.0  ;;  %vm3903_vm7 = vmmov %vm3902_vm6  ;;  %v274_v52 = vadd.f32 1.0, %v3904_v20  ;;  %v273_v63 = vadd.f32 1.0, %v3905_v24  ;;  %vm1557_vm8 = vcmask 7168  }
 0x312   :  { %1527 = vadd.xlane.f32.xlu1 %v1502_v34  ;;  %935 = vadd.xlane.f32.xlu0 %v909_v47  ;;  %v1508_v49 = vsel %vm3903_vm7, %v1492_v57, 0.0  ;;  %v3581_v60 = vpop.xlane.xlu1 %191  ;;  %v291_v59 = vmax.f32 %v182_v50, 1.0  ;;  %v275_v48 = vadd.f32 1.0, %v3906_v61  ;;  %v3907_v50 = vld [vmem:[#allocation57_spill] sm:$0xff] }
 0x313   :  { %v306_v27 = vmul.f32 %v290_v37, %v274_v52  ;;  %v305_v17 = vmul.f32 %v289_v56, %v273_v63  ;;  %v3909_v37 = vld [vmem:[#allocation59_spill] sm:$0xff] }
 0x314   :  { %v186_v32 = vpop.xlane.xlu0 %185  ;;  %v307_v34 = vmul.f32 %v291_v59, %v275_v48  ;;  %v278_v56 = vadd.f32 1.0, %v3909_v37 }
 0x315   :  { %2164 = vrcp.f32 %v306_v27 }
 0x316   :  { %1529 = vadd.xlane.f32.xlu1 %v1503_v45  ;;  %937 = vadd.xlane.f32.xlu0 %v910_v10  ;;  %v3585_v42 = vpop.xlane.xlu1 %195  ;;  %2166 = vrcp.f32 %v305_v17 }
 0x317   :  { %2168 = vrcp.f32 %v307_v34 }
 0x318   :  { %v3583_v51 = vpop.xlane.xlu0 %189 }
 0x31a   :  { %1531 = vadd.xlane.f32.xlu1 %v1504_v43  ;;  %939 = vadd.xlane.f32.xlu0 %v911_v25  ;;  %v3591_v4 = vpop.xlane.xlu1 %199 }
 0x31c   :  { %v3587_v21 = vpop.xlane.xlu0 %193 }
 0x31e   :  { %1533 = vadd.xlane.f32.xlu1 %v1505_v58  ;;  %941 = vadd.xlane.f32.xlu0 %v912_v31  ;;  %v3595_v0 = vpop.xlane.xlu1 %203  ;;  %v292_v31 = vmax.f32 %v3569_v46, 1.0 }
 0x31f   :  { %v2165_v40 = vpop.eup %2164 }
 0x320   :  { %v3593_v38 = vpop.xlane.xlu0 %197  ;;  %v2167_v26 = vpop.eup %2166 }
 0x321   :  { %v2169_v43 = vpop.eup %2168 }
 0x322   :  { %1535 = vadd.xlane.f32.xlu1 %v1506_v11  ;;  %943 = vadd.xlane.f32.xlu0 %v913_v55  ;;  %v3599_v13 = vpop.xlane.xlu1 %207  ;;  %v276_v11 = vadd.f32 1.0, %v3907_v50  ;;  %v293_v55 = vmax.f32 %v186_v32, 1.0  ;;  %v297_v50 = vmax.f32 %v3587_v21, 1.0  ;;  %v283_v21 = vadd.f32 1.0, %v3354_v36 }
 0x323   :  { %v285_v36 = vadd.f32 1.0, %v3396_v54 }
 0x324   :  { %v3597_v14 = vpop.xlane.xlu0 %201  ;;  %v308_v41 = vmul.f32 %v292_v31, %v276_v11 }
 0x326   :  { %1537 = vadd.xlane.f32.xlu1 %v1507_v35  ;;  %945 = vadd.xlane.f32.xlu0 %v914_v7  ;;  %v3908_v35 = vld [vmem:[#allocation60_spill] sm:$0xff]  ;;  %2170 = vrcp.f32 %v308_v41  ;;  %v294_v7 = vmax.f32 %v188_v30, 1.0  ;;  %v3910_v41 = vld [vmem:[#allocation61_spill] sm:$0xff] }
 0x327   :  { %v277_v22 = vadd.f32 1.0, %v3908_v35 }
 0x328   :  { %v3601_v8 = vpop.xlane.xlu0 %205  ;;  %v310_v20 = vmul.f32 %v294_v7, %v278_v56  ;;  %v300_v56 = vmax.f32 %v3591_v4, 1.0  ;;  %v302_v4 = vmax.f32 %v3595_v0, 1.0 }
 0x32a   :  { %1539 = vadd.xlane.f32.xlu1 %v1508_v49  ;;  %v309_v49 = vmul.f32 %v293_v55, %v277_v22  ;;  %v280_v55 = vadd.f32 1.0, %v3910_v41  ;;  %v298_v22 = vmax.f32 %v3585_v42, 1.0 }
 0x32c   :  { %2172 = vrcp.f32 %v309_v49 }
 0x32d   :  { %2174 = vrcp.f32 %v310_v20 }
 0x330   :  { %v2171_v52 = vpop.eup %2170 }
 0x347   :  { %v916_v16 = vpop.xlane.xlu1 %915  ;;  %v918_v9 = vpop.xlane.xlu0 %917 }
 0x348   :  { %v1541_v1 = vmul.f32 %v2167_v26, %v916_v16  ;;  %v1542_v28 = vmul.f32 %v2165_v40, %v918_v9  ;;  %v2173_v9 = vpop.eup %2172 }
 0x349   :  { %v2175_v61 = vpop.eup %2174 }
 0x34a   :  { %v1558_v57 = vsel %vm1557_vm8, %v1541_v1, 0.0  ;;  %v1559_v2 = vsel %vm1557_vm8, %v1542_v28, 0.0 }
 0x34b   :  { %v1560_v12 = vadd.f32 %v1559_v2, %v1558_v57 }
 0x34c   :  { %v1510_v6 = vpop.xlane.xlu1 %1509 }
 0x34d   :  { %v1600_v47 = vmul.f32 %v2167_v26, %v1510_v6 }
 0x34f   :  { %v1616_v29 = vsel %vm1557_vm8, %v1600_v47, 0.0 }
 0x352   :  { %v1512_v45 = vpop.xlane.xlu0 %1511 }
 0x353   :  { %v1601_v10 = vmul.f32 %v2165_v40, %v1512_v45 }
 0x355   :  { %v1617_v3 = vsel %vm1557_vm8, %v1601_v10, 0.0 }
 0x356   :  { %v1618_v39 = vadd.f32 %v1617_v3, %v1616_v29  ;;  %v295_v29 = vmax.f32 %v3583_v51, 1.0  ;;  %v281_v51 = vadd.f32 1.0, %v3286_v19 }
 0x358   :  { %v313_v7 = vmul.f32 %v297_v50, %v281_v51 }
 0x35c   :  { %v920_v18 = vpop.xlane.xlu0 %919 }
 0x35d   :  { %v1543_v25 = vmul.f32 %v2169_v43, %v920_v18  ;;  %v279_v18 = vadd.f32 1.0, %v3121_v44  ;;  %v282_v44 = vadd.f32 1.0, %v3279_v15 }
 0x35f   :  { %v1561_v58 = vsel %vm1557_vm8, %v1543_v25, 0.0  ;;  %v311_v31 = vmul.f32 %v295_v29, %v279_v18  ;;  %v314_v49 = vmul.f32 %v298_v22, %v282_v44 }
 0x360   :  { %v1562_v62 = vadd.f32 %v1561_v58, %v1560_v12  ;;  %v296_v58 = vmax.f32 %v3581_v60, 1.0  ;;  %v299_v60 = vmax.f32 %v3593_v38, 1.0 }
 0x361   :  { %2176 = vrcp.f32 %v311_v31 }
 0x362   :  { %v312_v35 = vmul.f32 %v296_v58, %v280_v55  ;;  %v315_v20 = vmul.f32 %v299_v60, %v283_v21 }
 0x364   :  { %2178 = vrcp.f32 %v312_v35  ;;  %v288_v35 = vadd.f32 1.0, %v3383_v5 }
 0x365   :  { %2180 = vrcp.f32 %v313_v7 }
 0x366   :  { %2182 = vrcp.f32 %v314_v49 }
 0x367   :  { %2184 = vrcp.f32 %v315_v20 }
 0x36b   :  { %v2177_v19 = vpop.eup %2176 }
 0x375   :  { %v1514_v24 = vpop.xlane.xlu1 %1513  ;;  %v1516_v63 = vpop.xlane.xlu0 %1515 }
 0x376   :  { %v1602_v27 = vmul.f32 %v2169_v43, %v1514_v24  ;;  %v1603_v17 = vmul.f32 %v2171_v52, %v1516_v63 }
 0x378   :  { %v1619_v46 = vsel %vm1557_vm8, %v1602_v27, 0.0  ;;  %v1621_v32 = vsel %vm1557_vm8, %v1603_v17, 0.0  ;;  %v301_v17 = vmax.f32 %v3597_v14, 1.0  ;;  %v286_v14 = vadd.f32 1.0, %v3352_v23 }
 0x379   :  { %v1620_v40 = vadd.f32 %v1619_v46, %v1618_v39  ;;  %v922_v26 = vpop.xlane.xlu1 %921  ;;  %v2179_v46 = vpop.eup %2178 }
 0x37a   :  { %v1544_v16 = vmul.f32 %v2171_v52, %v922_v26  ;;  %v284_v52 = vadd.f32 1.0, %v3301_v33 }
 0x37b   :  { %v1622_v30 = vadd.f32 %v1621_v32, %v1620_v40  ;;  %v924_v1 = vpop.xlane.xlu0 %923  ;;  %v2181_v40 = vpop.eup %2180 }
 0x37c   :  { %v1563_v28 = vsel %vm1557_vm8, %v1544_v16, 0.0  ;;  %v1545_v59 = vmul.f32 %v2173_v9, %v924_v1  ;;  %v316_v15 = vmul.f32 %v300_v56, %v284_v52  ;;  %v317_v1 = vmul.f32 %v301_v17, %v285_v36  ;;  %v2183_v54 = vpop.eup %2182 }
 0x37d   :  { %v1564_v57 = vadd.f32 %v1563_v28, %v1562_v62  ;;  %v1518_v12 = vpop.xlane.xlu1 %1517 }
 0x37e   :  { %v1565_v2 = vsel %vm1557_vm8, %v1545_v59, 0.0  ;;  %v1604_v34 = vmul.f32 %v2173_v9, %v1518_v12  ;;  %2186 = vrcp.f32 %v316_v15 }
 0x37f   :  { %v1566_v48 = vadd.f32 %v1565_v2, %v1564_v57  ;;  %v1520_v6 = vpop.xlane.xlu0 %1519  ;;  %2188 = vrcp.f32 %v317_v1 }
 0x380   :  { %v1605_v47 = vmul.f32 %v2175_v61, %v1520_v6  ;;  %v1623_v45 = vsel %vm1557_vm8, %v1604_v34, 0.0 }
 0x381   :  { %v1624_v10 = vadd.f32 %v1623_v45, %v1622_v30  ;;  %v926_v3 = vpop.xlane.xlu1 %925  ;;  %v303_v45 = vmax.f32 %v3601_v8, 1.0 }
 0x382   :  { %v1625_v39 = vsel %vm1557_vm8, %v1605_v47, 0.0  ;;  %v1546_v43 = vmul.f32 %v2175_v61, %v926_v3 }
 0x383   :  { %v1626_v25 = vadd.f32 %v1625_v39, %v1624_v10  ;;  %v2185_v39 = vpop.eup %2184 }
 0x384   :  { %v1567_v62 = vsel %vm1557_vm8, %v1546_v43, 0.0  ;;  %v287_v43 = vadd.f32 1.0, %v3443_v53 }
 0x385   :  { %v1568_v11 = vadd.f32 %v1567_v62, %v1566_v48  ;;  %v318_v48 = vmul.f32 %v302_v4, %v286_v14 }
 0x386   :  { %v319_v41 = vmul.f32 %v303_v45, %v287_v43 }
 0x387   :  { %2190 = vrcp.f32 %v318_v48 }
 0x388   :  { %v2187_v51 = vpop.eup %2186  ;;  %2192 = vrcp.f32 %v319_v41 }
 0x389   :  { %v2189_v56 = vpop.eup %2188 }
 0x38c   :  { %v928_v37 = vpop.xlane.xlu0 %927 }
 0x38d   :  { %v1547_v63 = vmul.f32 %v2177_v19, %v928_v37 }
 0x38f   :  { %v1569_v33 = vsel %vm1557_vm8, %v1547_v63, 0.0 }
 0x390   :  { %v1570_v28 = vadd.f32 %v1569_v33, %v1568_v11  ;;  %v304_v11 = vmax.f32 %v3599_v13, 1.0 }
 0x391   :  { %v2191_v15 = vpop.eup %2190 }
 0x392   :  { %v320_v37 = vmul.f32 %v304_v11, %v288_v35  ;;  %v2193_v33 = vpop.eup %2192 }
 0x393   :  { %v1522_v42 = vpop.xlane.xlu1 %1521  ;;  %v1524_v24 = vpop.xlane.xlu0 %1523 }
 0x394   :  { %v1606_v27 = vmul.f32 %v2177_v19, %v1522_v42  ;;  %v1607_v16 = vmul.f32 %v2179_v46, %v1524_v24  ;;  %2194 = vrcp.f32 %v320_v37 }
 0x396   :  { %v1627_v38 = vsel %vm1557_vm8, %v1606_v27, 0.0  ;;  %v1629_v34 = vsel %vm1557_vm8, %v1607_v16, 0.0 }
 0x397   :  { %v930_v26 = vpop.xlane.xlu1 %929  ;;  %v932_v32 = vpop.xlane.xlu0 %931  ;;  %v1628_v59 = vadd.f32 %v1627_v38, %v1626_v25 }
 0x398   :  { %v1548_v9 = vmul.f32 %v2179_v46, %v930_v26  ;;  %v1549_v30 = vmul.f32 %v2181_v40, %v932_v32 }
 0x399   :  { %v1630_v29 = vadd.f32 %v1629_v34, %v1628_v59 }
 0x39a   :  { %v1571_v57 = vsel %vm1557_vm8, %v1548_v9, 0.0  ;;  %v1573_v2 = vsel %vm1557_vm8, %v1549_v30, 0.0 }
 0x39b   :  { %v1572_v12 = vadd.f32 %v1571_v57, %v1570_v28  ;;  %v1526_v0 = vpop.xlane.xlu1 %1525  ;;  %v934_v61 = vpop.xlane.xlu0 %933 }
 0x39c   :  { %v1608_v6 = vmul.f32 %v2181_v40, %v1526_v0  ;;  %v1550_v47 = vmul.f32 %v2183_v54, %v934_v61 }
 0x39d   :  { %v1574_v10 = vadd.f32 %v1573_v2, %v1572_v12 }
 0x39e   :  { %v1631_v23 = vsel %vm1557_vm8, %v1608_v6, 0.0  ;;  %v1575_v3 = vsel %vm1557_vm8, %v1550_v47, 0.0  ;;  %v2195_v2 = vpop.eup %2194 }
 0x39f   :  { %v1632_v18 = vadd.f32 %v1631_v23, %v1630_v29  ;;  %v1528_v25 = vpop.xlane.xlu1 %1527  ;;  %v1576_v58 = vadd.f32 %v1575_v3, %v1574_v10  ;;  %v936_v62 = vpop.xlane.xlu0 %935 }
 0x3a0   :  { %v1609_v31 = vmul.f32 %v2183_v54, %v1528_v25  ;;  %v1551_v50 = vmul.f32 %v2185_v39, %v936_v62 }
 0x3a2   :  { %v1633_v8 = vsel %vm1557_vm8, %v1609_v31, 0.0  ;;  %v1577_v55 = vsel %vm1557_vm8, %v1551_v50, 0.0 }
 0x3a3   :  { %v1634_v22 = vadd.f32 %v1633_v8, %v1632_v18  ;;  %v1530_v7 = vpop.xlane.xlu1 %1529  ;;  %v1578_v53 = vadd.f32 %v1577_v55, %v1576_v58  ;;  %v938_v44 = vpop.xlane.xlu0 %937 }
 0x3a4   :  { %v1610_v49 = vmul.f32 %v2185_v39, %v1530_v7  ;;  %v1552_v60 = vmul.f32 %v2187_v51, %v938_v44 }
 0x3a6   :  { %v1635_v21 = vsel %vm1557_vm8, %v1610_v49, 0.0  ;;  %v1579_v13 = vsel %vm1557_vm8, %v1552_v60, 0.0 }
 0x3a7   :  { %v1636_v20 = vadd.f32 %v1635_v21, %v1634_v22  ;;  %v1532_v19 = vpop.xlane.xlu1 %1531  ;;  %v1580_v52 = vadd.f32 %v1579_v13, %v1578_v53  ;;  %v940_v42 = vpop.xlane.xlu0 %939 }
 0x3a8   :  { %v1611_v24 = vmul.f32 %v2187_v51, %v1532_v19  ;;  %v1553_v63 = vmul.f32 %v2189_v56, %v940_v42 }
 0x3aa   :  { %v1637_v5 = vsel %vm1557_vm8, %v1611_v24, 0.0  ;;  %v1581_v27 = vsel %vm1557_vm8, %v1553_v63, 0.0 }
 0x3ab   :  { %v1638_v17 = vadd.f32 %v1637_v5, %v1636_v20  ;;  %v1534_v46 = vpop.xlane.xlu1 %1533  ;;  %v1582_v38 = vadd.f32 %v1581_v27, %v1580_v52  ;;  %v942_v40 = vpop.xlane.xlu0 %941 }
 0x3ac   :  { %v1612_v36 = vmul.f32 %v2189_v56, %v1534_v46  ;;  %v1554_v4 = vmul.f32 %v2191_v15, %v942_v40 }
 0x3ae   :  { %v1639_v26 = vsel %vm1557_vm8, %v1612_v36, 0.0  ;;  %v1583_v32 = vsel %vm1557_vm8, %v1554_v4, 0.0 }
 0x3af   :  { %v1640_v16 = vadd.f32 %v1639_v26, %v1638_v17  ;;  %v1536_v9 = vpop.xlane.xlu1 %1535  ;;  %v1584_v30 = vadd.f32 %v1583_v32, %v1582_v38  ;;  %v944_v1 = vpop.xlane.xlu0 %943 }
 0x3b0   :  { %v1613_v28 = vmul.f32 %v2191_v15, %v1536_v9  ;;  %v1555_v59 = vmul.f32 %v2193_v33, %v944_v1 }
 0x3b2   :  { %v1641_v14 = vsel %vm1557_vm8, %v1613_v28, 0.0  ;;  %v1585_v57 = vsel %vm1557_vm8, %v1555_v59, 0.0 }
 0x3b3   :  { %v1642_v54 = vadd.f32 %v1641_v14, %v1640_v16  ;;  %v1538_v12 = vpop.xlane.xlu1 %1537  ;;  %v1586_v0 = vadd.f32 %v1585_v57, %v1584_v30  ;;  %v946_v61 = vpop.xlane.xlu0 %945 }
 0x3b4   :  { %v1614_v48 = vmul.f32 %v2193_v33, %v1538_v12  ;;  %v1556_v34 = vmul.f32 %v2195_v2, %v946_v61 }
 0x3b6   :  { %v1643_v6 = vsel %vm1557_vm8, %v1614_v48, 0.0  ;;  %v1587_v47 = vsel %vm1557_vm8, %v1556_v34, 0.0 }
 0x3b7   :  { %v1644_v45 = vadd.f32 %v1643_v6, %v1642_v54  ;;  %v1540_v29 = vpop.xlane.xlu1 %1539  ;;  %v1588_v10 = vadd.f32 %v1587_v47, %v1586_v0 }
 0x3b8   :  { %v1615_v23 = vmul.f32 %v2195_v2, %v1540_v29 }
 0x3b9   :  { %1589 = vadd.xlane.f32.xlu0 %v1588_v10 }
 0x3ba   :  { %v1645_v3 = vsel %vm1557_vm8, %v1615_v23, 0.0 }
 0x3bb   :  { %v1646_v39 = vadd.f32 %v1645_v3, %v1644_v45 }
 0x3bd   :  { %1647 = vadd.xlane.f32.xlu1 %v1646_v39 }
 0x446   :  { %v1590_v43 = vpop.xlane.xlu0 %1589 }
 0x447   :  { %v1591_v18 = vrot.slane %v1590_v43, 4 }
 0x449   :  { %v1592_v25 = vadd.f32 %v1591_v18, %v1590_v43 }
 0x44a   :  { %v1648_v58 = vpop.xlane.xlu1 %1647 }
 0x44b   :  { %v1649_v62 = vrot.slane %v1648_v58, 4  ;;  %v1593_v31 = vrot.slane %v1592_v25, 2 }
 0x44d   :  { %v1650_v50 = vadd.f32 %v1649_v62, %v1648_v58  ;;  %v1594_v11 = vadd.f32 %v1593_v31, %v1592_v25 }
 0x44f   :  { %v1651_v41 = vrot.slane %v1650_v50, 2  ;;  %v1595_v8 = vrot.slane %v1594_v11, 1 }
 0x451   :  { %v1652_v55 = vadd.f32 %v1651_v41, %v1650_v50  ;;  %v1596_v51 = vadd.f32 %v1595_v8, %v1594_v11 }
 0x453   :  { %1960 = vpush %v1596_v51  ;;  %v1653_v35 = vrot.slane %v1652_v55, 1 }
 0x455   :  { %v1654_v22 = vadd.f32 %v1653_v35, %v1652_v55 }
 0x457   :  { %1962 = vpush %v1654_v22 }
 0x484   :  { %s1961_s26 = spop %1960 }
 0x485   :  { %v1598_v7 = vstv %s1961_s26 }
 0x486   :  { %1599 = vst [vmem:[#allocation8] sm:$0xff] %v1598_v7 }
 0x487   :  { %2273 = shalt.err (!%p2270_p0)
}
 0x488   :  { %s2274_s6 = scalar_lea.hbm %s3687_s3, 128 }
 0x489   :  { %p2275_p1 = scmp.ne.s32.totalorder %s3687_s3, %s2274_s6  ;;  %p2278_p2 = scmp.lt.u32.totalorder %s2274_s6, %s3687_s3 }
 0x48b   :  { %p2280_p3 = pnand %p2278_p2, %p2275_p1 }
 0x48d   :  { %2283 = shalt.err (!%p2280_p3)
}
 0x48e   :  { %1667 = dma.vmem_to_hbm [thread:$0]  %s1665_s25, 128, %s3687_s3, [#allocation4]  }
 0x48f   :  { %s1963_s1 = spop %1962  ;;  %s2284_s13 = scalar_lea.vmem %s1675_s28, 128 }
 0x490   :  { %v1656_v53 = vstv %s1963_s1  ;;  %p2285_p4 = scmp.ne.s32.totalorder %s1675_s28, %s2284_s13  ;;  %p2289_p5 = scmp.lt.s32.totalorder %s1675_s28, %s1675_s28 }
 0x491   :  { %1657 = vst [vmem:[#allocation9] sm:$0xff] %v1656_v53  ;;  %p2290_p6 = scmp.lt.s32.totalorder %s2284_s13, %s2284_s13 }
 0x493   :  { %p2291_p7 = por %p2290_p6, %p2289_p5 }
 0x495   :  { %p2292_p8 = pnand %p2291_p7, %p2285_p4 }
 0x497   :  { %2295 = shalt.err (!%p2292_p8)
}
 0x498   :  { %s2296_s16 = scalar_lea.hbm %s3688_s4, 128 }
 0x499   :  { %p2297_p9 = scmp.ne.s32.totalorder %s3688_s4, %s2296_s16  ;;  %p2300_p10 = scmp.lt.u32.totalorder %s2296_s16, %s3688_s4 }
 0x49b   :  { %p2302_p11 = pnand %p2300_p10, %p2297_p9 }
 0x49d   :  { %2305 = shalt.err (!%p2302_p11)
}
 0x49e   :  { %1677 = dma.vmem_to_hbm [thread:$0]  %s1675_s28, 128, %s3688_s4, [#allocation10]  }
 0x49f   :  { %2310 = dma.done.wait [#allocation4], 128  }
 0x4a0   :  { %2311 = vsyncadd [#allocation4], 4294967168 }
 0x4a1   :  { %2312 = dma.done.wait [#allocation10], 128  }
 0x4a2   :  { %2313 = vsyncadd [#allocation10], 4294967168 }
 0x4a3   :  { %1684 = vsyncpa [#allocation3], 1 }
 0x4a4   :  { %1685 = vsyncpa [#allocation6], 1 }
 0x4a5   :  { %1686 = vsyncpa [#allocation4], 1 }
 0x4a6   :  { %1687 = vsyncpa [#allocation10], 1 }

</bundles_post_ra>
